<compile_context>
chip_gen: v5e
topology: v5e:2x2
jax: 0.10.0
libtpu: 0.0.40
codegen_flags: <defaults>
</compile_context>

<pallas_src>
import functools

import jax
import jax.numpy as jnp
from jax import lax
from jax.experimental import pallas as pl
from jax.experimental.pallas import tpu as pltpu


# ----------------------------------------------------------------------------
# Fused kernel: encoder GEMM + self-attention + pooling + head + fc
# ----------------------------------------------------------------------------
def _fused_kernel(C, C8, N, compute_dtype, approx_recip,
                  p_ref, wc_ref, bc_ref, wqkv_ref, bqkv_ref, gamma_ref,
                  w1_ref, b1_ref, w2_ref, b2_ref,
                  feat_ref, logit_ref):
    f32 = jnp.float32
    cdt = compute_dtype
    BB = p_ref.shape[0]          # batch chunk handled by this grid step
    K = p_ref.shape[2]           # Cin*kh*kw

    # ---- encoder stand-in: conv-as-GEMM + bias + ReLU (stays in VMEM) ----
    # patches and wc are already in the compute dtype (pre-cast at pack time).
    p2d = p_ref[...].reshape(BB * N, K)
    fm = jnp.dot(p2d, wc_ref[...], preferred_element_type=f32) + bc_ref[...]
    fm = jnp.maximum(fm, 0.0)                                    # (BB*N, C) f32

    # ---- fused q/k/v projection: ONE matmul, then static lane slices ----
    qkv = jnp.dot(fm.astype(cdt), wqkv_ref[...],
                  preferred_element_type=f32) + bqkv_ref[...]    # (BB*N, 2*C8+C)
    q = qkv[:, :C8].reshape(BB, N, C8).astype(cdt)
    k = qkv[:, C8:2 * C8].reshape(BB, N, C8).astype(cdt)
    v = qkv[:, 2 * C8:].reshape(BB, N, C).astype(cdt)

    # ---- softmax(Q K^T) V, batched over BB (no in-kernel transposes) ----
    energy = jnp.einsum("bqd,bkd->bqk", q, k,
                        preferred_element_type=f32)              # (BB, N, N)
    mrow = jnp.max(energy, axis=-1, keepdims=True)
    pexp = jnp.exp(energy - mrow)
    denom = jnp.sum(pexp, axis=-1, keepdims=True)
    if approx_recip:
        attn = pexp * pl.reciprocal(denom, approx=True)          # EUP slot
    else:
        attn = pexp / denom
    out = jnp.einsum("bqk,bkd->bqd", attn.astype(cdt), v,
                     preferred_element_type=f32)                 # (BB, N, C)

    # residual scaled by sigmoid(gamma); gamma is an SMEM scalar (init -8)
    g = jax.nn.sigmoid(jnp.full((1, 1, 1), gamma_ref[0, 0], f32))
    y = fm.reshape(BB, N, C) + g * out                           # (BB, N, C)

    # ---- AdaptiveConcatPool2d([max, avg]) + Flatten + Linear(2C,512) + ReLU ----
    mx = jnp.max(y, axis=1)                                      # (BB, C)
    avg = jnp.sum(y, axis=1) * (1.0 / N)                         # (BB, C)
    pooled = jnp.concatenate([mx, avg], axis=-1).astype(cdt)     # (BB, 2C)
    feat = jnp.dot(pooled, w1_ref[...], preferred_element_type=f32) + b1_ref[...]
    feat = jnp.maximum(feat, 0.0)                                # (BB, 512) f32
    feat_ref[0] = feat

    # fc: num_classes zero-padded to a 128-lane slab -> lane-dense store
    logit_ref[0] = jnp.dot(feat.astype(cdt), w2_ref[...],
                           preferred_element_type=f32) + b2_ref[...]


def _pick_batch_block(bs, max_bb=32):
    """Largest divisor of bs that is <= max_bb AND leaves >=2 grid steps
    (so both v7x TensorCores get a 'parallel' step)."""
    if bs <= 1:
        return 1
    cap = max(1, min(max_bb, bs // 2))
    bb = cap
    while bs % bb:
        bb -= 1
    return bb


def _default_compute_dtype():
    """bf16 operands (f32 accumulation) on v6e/v7x; f32 elsewhere."""
    try:
        kind = jax.devices()[0].device_kind.lower()
    except Exception:  # no device info -> conservative
        return jnp.float32
    if "v6" in kind or "v7" in kind:
        return jnp.bfloat16
    return jnp.float32


def fused_attention_head(patches, packed, *, num_classes,
                         compute_dtype=jnp.float32, max_batch_block=32,
                         approx_recip=True):
    """patches: (bs, N, K) im2col rows; packed: kernel-ready parameter dict."""
    bs, N, K = patches.shape
    C = packed["wc"].shape[1]
    C8 = C // 8
    HID = packed["w1"].shape[1]
    PADC = packed["w2p"].shape[1]
    BB = _pick_batch_block(bs, max_batch_block)
    G = bs // BB

    # Patch operands stored in the compute dtype (halves DMA bytes for bf16).
    patches = patches.astype(compute_dtype)

    def full(shape):
        return pl.BlockSpec(shape, lambda b: (0,) * len(shape))

    in_specs = [
        pl.BlockSpec((BB, N, K), lambda b: (b, 0, 0)),           # patches chunk
        full((K, C)), full((1, C)),                              # conv W / b
        full((C, 2 * C8 + C)), full((1, 2 * C8 + C)),            # fused Wqkv / b
        pl.BlockSpec(memory_space=pltpu.MemorySpace.SMEM),       # gamma scalar
        full((2 * C, HID)), full((1, HID)),                      # head Linear
        full((HID, PADC)), full((1, PADC)),                      # fc (padded)
    ]
    # Outputs as (G, BB, lanes) so the trailing two block dims equal the full
    # array dims for any BB (valid even when BB is 1 / not a multiple of 8).
    out_specs = [
        pl.BlockSpec((1, BB, HID), lambda b: (b, 0, 0)),
        pl.BlockSpec((1, BB, PADC), lambda b: (b, 0, 0)),
    ]

    itemsize = jnp.dtype(compute_dtype).itemsize
    weight_elems = K * C + C * (2 * C8 + C) + 2 * C * HID + HID * PADC
    bias_elems = C + (2 * C8 + C) + HID + PADC + 1
    cost = pl.CostEstimate(
        flops=int(2 * bs * N * (K * C + C * (2 * C8 + C) + N * C8 + N * C)
                  + 2 * bs * (2 * C * HID + HID * PADC)),
        transcendentals=int(bs * N * N),
        bytes_accessed=int(bs * N * K * itemsize + weight_elems * itemsize
                           + bias_elems * 4 + bs * (HID + PADC) * 4),
    )

    feat, logits_p = pl.pallas_call(
        functools.partial(_fused_kernel, C, C8, N, compute_dtype, approx_recip),
        grid=(G,),
        in_specs=in_specs,
        out_specs=out_specs,
        out_shape=(
            jax.ShapeDtypeStruct((G, BB, HID), jnp.float32),
            jax.ShapeDtypeStruct((G, BB, PADC), jnp.float32),
        ),
        compiler_params=pltpu.CompilerParams(
            dimension_semantics=("parallel",)),
        cost_estimate=cost,
    )(patches, packed["wc"], packed["bc"], packed["wqkv"], packed["bqkv"],
      packed["gamma"], packed["w1"], packed["b1"], packed["w2p"], packed["b2p"])

    feat = feat.reshape(bs, HID)
    logits = logits_p.reshape(bs, PADC)[:, :num_classes]
    return feat, logits


# ----------------------------------------------------------------------------
# Parameter packing (all matmul weights pre-cast to the compute dtype)
# ----------------------------------------------------------------------------
def _pack_params(params, compute_dtype=jnp.float32):
    cdt = compute_dtype
    C = params["conv_w"].shape[0]
    K = int(params["conv_w"].size) // C
    num_classes = params["w2"].shape[1]
    padc = ((num_classes + 127) // 128) * 128
    w2p = jnp.zeros((params["w2"].shape[0], padc), jnp.float32)
    w2p = w2p.at[:, :num_classes].set(params["w2"])
    b2p = jnp.zeros((1, padc), jnp.float32).at[:, :num_classes].set(params["b2"])
    return {
        # matmul operands -> compute dtype (casts done ONCE here, not per step)
        "wc": params["conv_w"].reshape(C, K).T.astype(cdt),       # (K, C)
        "wqkv": jnp.concatenate(
            [params["wq"], params["wk"], params["wv"]], axis=1).astype(cdt),
        "w1": params["w1"].astype(cdt),
        "w2p": w2p.astype(cdt),
        # biases / gamma stay f32 (added to f32 accumulators)
        "bc": params["conv_b"].reshape(1, C).astype(jnp.float32),
        "bqkv": jnp.concatenate(
            [params["bq"], params["bk"], params["bv"]], axis=1).astype(jnp.float32),
        "b1": params["b1"].astype(jnp.float32),
        "b2p": b2p,
        "gamma": params["gamma"].astype(jnp.float32),             # (1,1) -> SMEM
    }


# ----------------------------------------------------------------------------
# Exact im2col (pure data movement, no dot -> no MXU precision passes)
# ----------------------------------------------------------------------------
def _extract_patches(x):
    bs, n, ch, H, W = x.shape
    Ho = (H + 2 - 3) // 2 + 1
    Wo = (W + 2 - 3) // 2 + 1
    xf = jnp.transpose(x.reshape(bs * n, ch, H, W), (0, 2, 3, 1))   # NHWC
    xp = jnp.pad(xf, ((0, 0), (1, 1), (1, 1), (0, 0)))
    taps = [xp[:, dh:dh + 2 * (Ho - 1) + 1:2, dw:dw + 2 * (Wo - 1) + 1:2, :]
            for dh in range(3) for dw in range(3)]
    t = jnp.stack(taps, axis=-1)                 # (bs*n, Ho, Wo, ch, 9)
    # K ordering (in_ch slowest, then kh, kw) matches conv_w.reshape(C, K).
    return t.reshape(bs, n * Ho * Wo, ch * 9)    # (bs, N=(n,Ho,Wo), K)


# ----------------------------------------------------------------------------
# Full forward (mirrors the PyTorch module's forward)
# ----------------------------------------------------------------------------
def forward(x, params, *, num_classes=2, compute_dtype=None,
            max_batch_block=32, approx_recip=True):
    if compute_dtype is None:
        compute_dtype = _default_compute_dtype()
    patches = _extract_patches(x)
    packed = _pack_params(params, compute_dtype)
    return fused_attention_head(patches, packed, num_classes=num_classes,
                                compute_dtype=compute_dtype,
                                max_batch_block=max_batch_block,
                                approx_recip=approx_recip)


# ----------------------------------------------------------------------------
# Pure-JAX reference (same math, no Pallas) for sanity checking
# ----------------------------------------------------------------------------
def forward_ref(x, params, *, num_classes=2):
    bs, n, ch, H, W = x.shape
    xf = x.reshape(bs * n, ch, H, W)
    fm = jax.lax.conv_general_dilated(
        xf, params["conv_w"], window_strides=(2, 2), padding=((1, 1), (1, 1)),
        dimension_numbers=("NCHW", "OIHW", "NCHW"))
    fm = jnp.maximum(fm + params["conv_b"][None, :, None, None], 0.0)
    bs2, C, H2, W2 = fm.shape
    x2 = fm.reshape(bs, n, C, H2, W2).transpose(0, 2, 1, 3, 4).reshape(bs, C, n * H2, W2)
    xc = x2.reshape(bs, C, -1)                        # (bs, C, N)
    xT = jnp.transpose(xc, (0, 2, 1))                 # (bs, N, C)
    q = xT @ params["wq"] + params["bq"]
    k = xT @ params["wk"] + params["bk"]
    v = xT @ params["wv"] + params["bv"]
    attn = jax.nn.softmax(q @ jnp.transpose(k, (0, 2, 1)), axis=-1)
    out = attn @ v
    y = jax.nn.sigmoid(params["gamma"][0, 0]) * out + xT
    mx = jnp.max(y, axis=1)
    avg = jnp.mean(y, axis=1)
    pooled = jnp.concatenate([mx, avg], axis=-1)
    feat = jnp.maximum(pooled @ params["w1"] + params["b1"], 0.0)
    logits = feat @ params["w2"] + params["b2"]
    return feat, logits


# ----------------------------------------------------------------------------
def make_params(key, *, in_channels=3, nc=32, num_classes=2):
    ks = jax.random.split(key, 10)
    s = 0.05
    C8 = nc // 8
    return {
        "conv_w": s * jax.random.normal(ks[0], (nc, in_channels, 3, 3), jnp.float32),
        "conv_b": s * jax.random.normal(ks[1], (nc,), jnp.float32),
        "wq": s * jax.random.normal(ks[2], (nc, C8), jnp.float32),
        "bq": jnp.zeros((1, C8), jnp.float32),
        "wk": s * jax.random.normal(ks[3], (nc, C8), jnp.float32),
        "bk": jnp.zeros((1, C8), jnp.float32),
        "wv": s * jax.random.normal(ks[4], (nc, nc), jnp.float32),
        "bv": jnp.zeros((1, nc), jnp.float32),
        "gamma": jnp.full((1, 1), -8.0, jnp.float32),   # initial_gamma = -8
        "w1": s * jax.random.normal(ks[5], (2 * nc, 512), jnp.float32),
        "b1": s * jax.random.normal(ks[6], (1, 512), jnp.float32),
        "w2": s * jax.random.normal(ks[7], (512, num_classes), jnp.float32),
        "b2": s * jax.random.normal(ks[8], (1, num_classes), jnp.float32),
    }


if __name__ == "__main__":
    key = jax.random.PRNGKey(0)
    pkey, xkey = jax.random.split(key)

    bs, n, ch, H, W = 2, 2, 3, 16, 16      # encoder out (4, 32, 8, 8) -> N = 128
    num_classes = 2
    params = make_params(pkey, in_channels=ch, nc=32, num_classes=num_classes)
    x = jax.random.normal(xkey, (bs, n, ch, H, W), jnp.float32)

    feat_r, logits_r = forward_ref(x, params, num_classes=num_classes)

    # f32 strict-accuracy path (v5e-friendly default)
    fwd32 = jax.jit(functools.partial(forward, num_classes=num_classes,
                                      compute_dtype=jnp.float32))
    feat, logits = fwd32(x, params)
    jax.block_until_ready((feat, logits))
    assert feat.shape == (bs, 512) and logits.shape == (bs, num_classes)
    assert jnp.allclose(feat, feat_r, atol=1e-3, rtol=1e-3)
    assert jnp.allclose(logits, logits_r, atol=1e-3, rtol=1e-3)

    # bf16 MXU path (v6e/v7x default): bf16 operands, f32 accumulation.
    fwd16 = jax.jit(functools.partial(forward, num_classes=num_classes,
                                      compute_dtype=jnp.bfloat16))
    feat_b, logits_b = fwd16(x, params)
    jax.block_until_ready((feat_b, logits_b))
    assert jnp.allclose(feat_b, feat_r, atol=5e-2, rtol=5e-2)
    assert jnp.allclose(logits_b, logits_r, atol=5e-2, rtol=5e-2)

    print("KERNEL_OK")
</pallas_src>

<mosaic_0001>
module attributes {stable_mosaic.version = 11 : i64} {
  func.func @_fused_kernel(%arg0: i32, %arg1: memref<1x128x27xf32, #tpu.memory_space<vmem>>, %arg2: memref<27x32xf32, #tpu.memory_space<vmem>>, %arg3: memref<1x32xf32, #tpu.memory_space<vmem>>, %arg4: memref<32x40xf32, #tpu.memory_space<vmem>>, %arg5: memref<1x40xf32, #tpu.memory_space<vmem>>, %arg6: memref<1x1xf32, #tpu.memory_space<smem>>, %arg7: memref<64x512xf32, #tpu.memory_space<vmem>>, %arg8: memref<1x512xf32, #tpu.memory_space<vmem>>, %arg9: memref<512x128xf32, #tpu.memory_space<vmem>>, %arg10: memref<1x128xf32, #tpu.memory_space<vmem>>, %arg11: memref<1x1x512xf32, #tpu.memory_space<vmem>>, %arg12: memref<1x1x128xf32, #tpu.memory_space<vmem>>) attributes {dimension_semantics = [#tpu.dimension_semantics<parallel>], iteration_bounds = array<i64: 2>, scalar_prefetch = 0 : i64, scratch_operands = 0 : i64, tpu.core_type = #tpu.core_type<tc>, window_params = [{transform_indices = @transform_0, window_bounds = array<i64: 1, 128, 27>}, {pipeline_mode = #tpu.pipeline_mode<synchronous>, transform_indices = @transform_1, window_bounds = array<i64: 27, 32>}, {pipeline_mode = #tpu.pipeline_mode<synchronous>, transform_indices = @transform_2, window_bounds = array<i64: 1, 32>}, {pipeline_mode = #tpu.pipeline_mode<synchronous>, transform_indices = @transform_3, window_bounds = array<i64: 32, 40>}, {pipeline_mode = #tpu.pipeline_mode<synchronous>, transform_indices = @transform_4, window_bounds = array<i64: 1, 40>}, {transform_indices = @transform_5, window_bounds = array<i64: 1, 1>}, {pipeline_mode = #tpu.pipeline_mode<synchronous>, transform_indices = @transform_6, window_bounds = array<i64: 64, 512>}, {pipeline_mode = #tpu.pipeline_mode<synchronous>, transform_indices = @transform_7, window_bounds = array<i64: 1, 512>}, {pipeline_mode = #tpu.pipeline_mode<synchronous>, transform_indices = @transform_8, window_bounds = array<i64: 512, 128>}, {pipeline_mode = #tpu.pipeline_mode<synchronous>, transform_indices = @transform_9, window_bounds = array<i64: 1, 128>}, {transform_indices = @transform_10, window_bounds = array<i64: 1, 1, 512>}, {transform_indices = @transform_11, window_bounds = array<i64: 1, 1, 128>}]} {
    %c0 = arith.constant 0 : index
    %c0_0 = arith.constant 0 : index
    %c0_1 = arith.constant 0 : index
    %0 = vector.load %arg1[%c0, %c0_0, %c0_1] : memref<1x128x27xf32, #tpu.memory_space<vmem>>, vector<1x128x27xf32>
    %1 = vector.shape_cast %0 : vector<1x128x27xf32> to vector<128x27xf32>
    %c0_2 = arith.constant 0 : index
    %c0_3 = arith.constant 0 : index
    %2 = vector.load %arg2[%c0_2, %c0_3] : memref<27x32xf32, #tpu.memory_space<vmem>>, vector<27x32xf32>
    %cst = arith.constant dense<0.000000e+00> : vector<128x32xf32>
    %3 = tpu.matmul %1, %2, %cst {dimension_numbers = #tpu.dot_dimension_numbers<[1], [0], [0], [1], [0, 0, 1, 1], [], []>} : vector<128x27xf32>, vector<27x32xf32>, vector<128x32xf32> -> vector<128x32xf32>
    %c0_4 = arith.constant 0 : index
    %c0_5 = arith.constant 0 : index
    %4 = vector.load %arg3[%c0_4, %c0_5] : memref<1x32xf32, #tpu.memory_space<vmem>>, vector<1x32xf32>
    %5 = vector.broadcast %4 : vector<1x32xf32> to vector<128x32xf32>
    %6 = arith.addf %3, %5 : vector<128x32xf32>
    %cst_6 = arith.constant 0.000000e+00 : f32
    %7 = vector.broadcast %cst_6 : f32 to vector<128x32xf32>
    %8 = arith.maximumf %6, %7 : vector<128x32xf32>
    %c0_7 = arith.constant 0 : index
    %c0_8 = arith.constant 0 : index
    %9 = vector.load %arg4[%c0_7, %c0_8] : memref<32x40xf32, #tpu.memory_space<vmem>>, vector<32x40xf32>
    %cst_9 = arith.constant dense<0.000000e+00> : vector<128x40xf32>
    %10 = tpu.matmul %8, %9, %cst_9 {dimension_numbers = #tpu.dot_dimension_numbers<[1], [0], [0], [1], [0, 0, 1, 1], [], []>} : vector<128x32xf32>, vector<32x40xf32>, vector<128x40xf32> -> vector<128x40xf32>
    %c0_10 = arith.constant 0 : index
    %c0_11 = arith.constant 0 : index
    %11 = vector.load %arg5[%c0_10, %c0_11] : memref<1x40xf32, #tpu.memory_space<vmem>>, vector<1x40xf32>
    %12 = vector.broadcast %11 : vector<1x40xf32> to vector<128x40xf32>
    %13 = arith.addf %10, %12 : vector<128x40xf32>
    %14 = vector.extract_strided_slice %13 {offsets = [0, 0], sizes = [128, 4], strides = [1, 1]} : vector<128x40xf32> to vector<128x4xf32>
    %15 = vector.shape_cast %14 : vector<128x4xf32> to vector<1x128x4xf32>
    %16 = vector.extract_strided_slice %13 {offsets = [0, 4], sizes = [128, 4], strides = [1, 1]} : vector<128x40xf32> to vector<128x4xf32>
    %17 = vector.shape_cast %16 : vector<128x4xf32> to vector<1x128x4xf32>
    %18 = vector.extract_strided_slice %13 {offsets = [0, 8], sizes = [128, 32], strides = [1, 1]} : vector<128x40xf32> to vector<128x32xf32>
    %19 = vector.shape_cast %18 : vector<128x32xf32> to vector<1x128x32xf32>
    "tpu.trace_start"() <{level = 10 : i32, message = "bqd,bkd->bqk"}> : () -> ()
    %cst_12 = arith.constant dense<0.000000e+00> : vector<1x128x128xf32>
    %20 = tpu.matmul %15, %17, %cst_12 {dimension_numbers = #tpu.dot_dimension_numbers<[2], [2], [1], [1], [0, 0, 0, 1, 1, 1], [0], [0]>} : vector<1x128x4xf32>, vector<1x128x4xf32>, vector<1x128x128xf32> -> vector<1x128x128xf32>
    "tpu.trace_stop"() : () -> ()
    %cst_13 = arith.constant dense<0xFF800000> : vector<1x128xf32>
    %21 = vector.multi_reduction <maximumf>, %20, %cst_13 [2] : vector<1x128x128xf32> to vector<1x128xf32>
    %22 = vector.shape_cast %21 : vector<1x128xf32> to vector<1x128x1xf32>
    %23 = vector.broadcast %22 : vector<1x128x1xf32> to vector<1x128x128xf32>
    %24 = arith.subf %20, %23 : vector<1x128x128xf32>
    %25 = math.exp %24 : vector<1x128x128xf32>
    %cst_14 = arith.constant dense<0.000000e+00> : vector<1x128xf32>
    %26 = vector.multi_reduction <add>, %25, %cst_14 [2] : vector<1x128x128xf32> to vector<1x128xf32>
    %27 = vector.shape_cast %26 : vector<1x128xf32> to vector<1x128x1xf32>
    %28 = tpu.reciprocal %27 {approx = true} : vector<1x128x1xf32> -> vector<1x128x1xf32>
    %29 = vector.broadcast %28 : vector<1x128x1xf32> to vector<1x128x128xf32>
    %30 = arith.mulf %25, %29 : vector<1x128x128xf32>
    "tpu.trace_start"() <{level = 10 : i32, message = "bqk,bkd->bqd"}> : () -> ()
    %cst_15 = arith.constant dense<0.000000e+00> : vector<1x128x32xf32>
    %31 = tpu.matmul %30, %19, %cst_15 {dimension_numbers = #tpu.dot_dimension_numbers<[2], [1], [1], [2], [0, 0, 0, 1, 1, 2], [0], [0]>} : vector<1x128x128xf32>, vector<1x128x32xf32>, vector<1x128x32xf32> -> vector<1x128x32xf32>
    "tpu.trace_stop"() : () -> ()
    %c0_16 = arith.constant 0 : index
    %c0_17 = arith.constant 0 : index
    %32 = memref.load %arg6[%c0_16, %c0_17] : memref<1x1xf32, #tpu.memory_space<smem>>
    %33 = vector.broadcast %32 : f32 to vector<1x1x1xf32>
    %34 = arith.negf %33 : vector<1x1x1xf32>
    %35 = math.exp %34 : vector<1x1x1xf32>
    %cst_18 = arith.constant 1.000000e+00 : f32
    %36 = vector.broadcast %cst_18 : f32 to vector<1x1x1xf32>
    %37 = arith.addf %36, %35 : vector<1x1x1xf32>
    %38 = arith.divf %36, %37 : vector<1x1x1xf32>
    %39 = vector.shape_cast %8 : vector<128x32xf32> to vector<1x128x32xf32>
    %40 = vector.broadcast %38 : vector<1x1x1xf32> to vector<1x128x32xf32>
    %41 = arith.mulf %40, %31 : vector<1x128x32xf32>
    %42 = arith.addf %39, %41 : vector<1x128x32xf32>
    %cst_19 = arith.constant dense<0xFF800000> : vector<1x32xf32>
    %43 = vector.multi_reduction <maximumf>, %42, %cst_19 [1] : vector<1x128x32xf32> to vector<1x32xf32>
    %cst_20 = arith.constant dense<0.000000e+00> : vector<1x32xf32>
    %44 = vector.multi_reduction <add>, %42, %cst_20 [1] : vector<1x128x32xf32> to vector<1x32xf32>
    %cst_21 = arith.constant 7.812500e-03 : f32
    %45 = vector.broadcast %cst_21 : f32 to vector<1x32xf32>
    %46 = arith.mulf %44, %45 : vector<1x32xf32>
    %47 = tpu.concatenate %43, %46 in 1 : vector<1x32xf32>, vector<1x32xf32> -> vector<1x64xf32>
    %c0_22 = arith.constant 0 : index
    %c0_23 = arith.constant 0 : index
    %48 = vector.load %arg7[%c0_22, %c0_23] : memref<64x512xf32, #tpu.memory_space<vmem>>, vector<64x512xf32>
    %cst_24 = arith.constant dense<0.000000e+00> : vector<1x512xf32>
    %49 = tpu.matmul %47, %48, %cst_24 {dimension_numbers = #tpu.dot_dimension_numbers<[1], [0], [0], [1], [0, 0, 1, 1], [], []>} : vector<1x64xf32>, vector<64x512xf32>, vector<1x512xf32> -> vector<1x512xf32>
    %c0_25 = arith.constant 0 : index
    %c0_26 = arith.constant 0 : index
    %50 = vector.load %arg8[%c0_25, %c0_26] : memref<1x512xf32, #tpu.memory_space<vmem>>, vector<1x512xf32>
    %51 = arith.addf %49, %50 : vector<1x512xf32>
    %cst_27 = arith.constant 0.000000e+00 : f32
    %52 = vector.broadcast %cst_27 : f32 to vector<1x512xf32>
    %53 = arith.maximumf %51, %52 : vector<1x512xf32>
    %c0_28 = arith.constant 0 : index
    %c0_29 = arith.constant 0 : index
    %c0_30 = arith.constant 0 : index
    %54 = vector.load %arg11[%c0_28, %c0_29, %c0_30] : memref<1x1x512xf32, #tpu.memory_space<vmem>>, vector<1x1x512xf32>
    %55 = vector.shape_cast %54 : vector<1x1x512xf32> to vector<1x512xf32>
    %56 = vector.shape_cast %53 : vector<1x512xf32> to vector<1x1x512xf32>
    tpu.vector_store %arg11[%c0_28, %c0_29, %c0_30], %56 {strides = array<i32>} : memref<1x1x512xf32, #tpu.memory_space<vmem>>, vector<1x1x512xf32>,
    %c0_31 = arith.constant 0 : index
    %c0_32 = arith.constant 0 : index
    %57 = vector.load %arg9[%c0_31, %c0_32] : memref<512x128xf32, #tpu.memory_space<vmem>>, vector<512x128xf32>
    %cst_33 = arith.constant dense<0.000000e+00> : vector<1x128xf32>
    %58 = tpu.matmul %53, %57, %cst_33 {dimension_numbers = #tpu.dot_dimension_numbers<[1], [0], [0], [1], [0, 0, 1, 1], [], []>} : vector<1x512xf32>, vector<512x128xf32>, vector<1x128xf32> -> vector<1x128xf32>
    %c0_34 = arith.constant 0 : index
    %c0_35 = arith.constant 0 : index
    %59 = vector.load %arg10[%c0_34, %c0_35] : memref<1x128xf32, #tpu.memory_space<vmem>>, vector<1x128xf32>
    %60 = arith.addf %58, %59 : vector<1x128xf32>
    %c0_36 = arith.constant 0 : index
    %c0_37 = arith.constant 0 : index
    %c0_38 = arith.constant 0 : index
    %61 = vector.load %arg12[%c0_36, %c0_37, %c0_38] : memref<1x1x128xf32, #tpu.memory_space<vmem>>, vector<1x1x128xf32>
    %62 = vector.shape_cast %61 : vector<1x1x128xf32> to vector<1x128xf32>
    %63 = vector.shape_cast %60 : vector<1x128xf32> to vector<1x1x128xf32>
    tpu.vector_store %arg12[%c0_36, %c0_37, %c0_38], %63 {strides = array<i32>} : memref<1x1x128xf32, #tpu.memory_space<vmem>>, vector<1x1x128xf32>,
    return
  }
  func.func @transform_0(%arg0: i32) -> (i32, i32, i32) {
    %c0_i32 = arith.constant 0 : i32
    %c0_i32_0 = arith.constant 0 : i32
    %c0_i32_1 = arith.constant 0 : i32
    return %arg0, %c0_i32, %c0_i32_0 : i32, i32, i32
  }
  func.func @transform_1(%arg0: i32) -> (i32, i32) {
    %c0_i32 = arith.constant 0 : i32
    %c0_i32_0 = arith.constant 0 : i32
    %c0_i32_1 = arith.constant 0 : i32
    return %c0_i32, %c0_i32_0 : i32, i32
  }
  func.func @transform_2(%arg0: i32) -> (i32, i32) {
    %c0_i32 = arith.constant 0 : i32
    %c0_i32_0 = arith.constant 0 : i32
    %c0_i32_1 = arith.constant 0 : i32
    return %c0_i32, %c0_i32_0 : i32, i32
  }
  func.func @transform_3(%arg0: i32) -> (i32, i32) {
    %c0_i32 = arith.constant 0 : i32
    %c0_i32_0 = arith.constant 0 : i32
    %c0_i32_1 = arith.constant 0 : i32
    return %c0_i32, %c0_i32_0 : i32, i32
  }
  func.func @transform_4(%arg0: i32) -> (i32, i32) {
    %c0_i32 = arith.constant 0 : i32
    %c0_i32_0 = arith.constant 0 : i32
    %c0_i32_1 = arith.constant 0 : i32
    return %c0_i32, %c0_i32_0 : i32, i32
  }
  func.func @transform_5(%arg0: i32) -> (i32, i32) {
    %c0_i32 = arith.constant 0 : i32
    %c0_i32_0 = arith.constant 0 : i32
    %c0_i32_1 = arith.constant 0 : i32
    return %c0_i32, %c0_i32_0 : i32, i32
  }
  func.func @transform_6(%arg0: i32) -> (i32, i32) {
    %c0_i32 = arith.constant 0 : i32
    %c0_i32_0 = arith.constant 0 : i32
    %c0_i32_1 = arith.constant 0 : i32
    return %c0_i32, %c0_i32_0 : i32, i32
  }
  func.func @transform_7(%arg0: i32) -> (i32, i32) {
    %c0_i32 = arith.constant 0 : i32
    %c0_i32_0 = arith.constant 0 : i32
    %c0_i32_1 = arith.constant 0 : i32
    return %c0_i32, %c0_i32_0 : i32, i32
  }
  func.func @transform_8(%arg0: i32) -> (i32, i32) {
    %c0_i32 = arith.constant 0 : i32
    %c0_i32_0 = arith.constant 0 : i32
    %c0_i32_1 = arith.constant 0 : i32
    return %c0_i32, %c0_i32_0 : i32, i32
  }
  func.func @transform_9(%arg0: i32) -> (i32, i32) {
    %c0_i32 = arith.constant 0 : i32
    %c0_i32_0 = arith.constant 0 : i32
    %c0_i32_1 = arith.constant 0 : i32
    return %c0_i32, %c0_i32_0 : i32, i32
  }
  func.func @transform_10(%arg0: i32) -> (i32, i32, i32) {
    %c0_i32 = arith.constant 0 : i32
    %c0_i32_0 = arith.constant 0 : i32
    %c0_i32_1 = arith.constant 0 : i32
    return %arg0, %c0_i32, %c0_i32_0 : i32, i32, i32
  }
  func.func @transform_11(%arg0: i32) -> (i32, i32, i32) {
    %c0_i32 = arith.constant 0 : i32
    %c0_i32_0 = arith.constant 0 : i32
    %c0_i32_1 = arith.constant 0 : i32
    return %arg0, %c0_i32, %c0_i32_0 : i32, i32, i32
  }
}

</mosaic_0001>

<bundles_post_ra>
// kernel: forward.1
= control target key start
LH: loop header
LB: loop body
LE: loop exit
PB: predicated region body
PF: predicated region fallthrough
CT: control target
= control target key end

     0   :  { %s2896_s0 = inlined_call_operand.vmem [shape: f32[2,128,27], index: 0, kind: input, shape index: {}]   ;;  %s2897_s1 = inlined_call_operand.vmem [shape: f32[27,32], index: 1, kind: input, shape index: {}]   ;;  %s2898_s2 = inlined_call_operand.vmem [shape: f32[1,32], index: 2, kind: input, shape index: {}]   ;;  %s2899_s3 = inlined_call_operand.vmem [shape: f32[32,40], index: 3, kind: input, shape index: {}]   ;;  %s2900_s4 = inlined_call_operand.vmem [shape: f32[1,40], index: 4, kind: input, shape index: {}]   ;;  %s2901_s5 = inlined_call_operand.<no memory space> [shape: f32[1,1], index: 5, kind: input, shape index: {}]   ;;  %s2902_s6 = inlined_call_operand.vmem [shape: f32[64,512], index: 6, kind: input, shape index: {}]   ;;  %s2903_s7 = inlined_call_operand.vmem [shape: f32[1,512], index: 7, kind: input, shape index: {}]   ;;  %s2904_s8 = inlined_call_operand.vmem [shape: f32[512,128], index: 8, kind: input, shape index: {}]   ;;  %s2905_s9 = inlined_call_operand.vmem [shape: f32[1,128], index: 9, kind: input, shape index: {}]   ;;  %s2906_s10 = inlined_call_operand.vmem [shape: f32[2,1,512], index: 10, kind: output, shape index: {0}]   ;;  %s2907_s11 = inlined_call_operand.hbm [shape: f32[2,1,128], index: 11, kind: output, shape index: {1}]  }
   0x1   :  { %17 = sst [smem:[#allocation2]] %s2901_s5 }
   0x2   :  { %18 = vsyncpa [#allocation4], 0 }
   0x3   :  { %20 = vsyncpa [#allocation4 + $0x1], 0  ;;  %s2000_s19 = smov 0   ;;  %s2002_s20 = smov 0  }
   0x4   :  { %s2004_s21 = smov 0   ;;  %s2006_s22 = smov 0  }
   0x5 LB: > { %s2021_s5 = sadd.s32 4294967295, %s1932_s22   ;;  %s1638_s23 = sadd.s32 4294967294, %s1932_s22   ;;  %s1932_s22 = sphi %s2006_s22, %s2913_s22   ;;  %s1928_s21 = sphi %s2004_s21, %s2912_s21   ;;  %s1924_s20 = sphi %s2002_s20, %s2911_s20   ;;  %s1920_s19 = sphi %s2000_s19, %s2910_s19  }
   0x6   : > { %s2025_s24 = sadd.s32 1, %s1932_s22   ;;  %s274_s25 = sadd.s32 1, %s1928_s21 }
   0x7   : > { %s271_s26 = ssub.s32 %s1932_s22, %s2025_s24  ;;  %p284_p0 = scmp.ne.s32.totalorder %s1928_s21, %s1924_s20 }
   0x8   : > { %p272_p1 = scmp.eq.s32.totalorder %s271_s26, 0  ;;  %p285_p2 = scmp.eq.s32.totalorder %s2021_s5, 1 }
   0x9   : > { %p290_p3 = scmp.ne.s32.totalorder %s1924_s20, %s1920_s19  ;;  %p291_p4 = scmp.eq.s32.totalorder %s1638_s23, 1 }
   0xa   : > { %s2036_s27 = scalar_select %p272_p1, %s1928_s21, %s274_s25  }
   0xb   : > { %p2038_p5 = por %p285_p2, %p284_p0  ;;  %p2042_p6 = por %p291_p4, %p290_p3 }
   0xc   : > { %p1641_p7 = scmp.ge.s32.totalorder %s1932_s22, 1  ;;  %p344_p8 = scmp.lt.s32.totalorder %s1932_s22, 3 }
   0xe   : > { %p345_p9 = pnand %p1641_p7, %p344_p8 }
   0xf   : > { %p387_p10 = scmp.lt.s32.totalorder (!%p345_p9), %s2021_s5, 1  ;;  %s1934_s15 = smov (!%p345_p9), 124  }
  0x10   : > { %348 = sbr.rel (%p345_p9) target bundleno = 1725 (0x6bd), region = 60  ;;  %s1935_s16 = smov (!%p345_p9), 120  }
  0x11   : > { %s1111_s18 = sld [smem:[#allocation2]] (!%p345_p9)  ;;  %s1936_s13 = smov (!%p345_p9), 32  }
  0x12   : > { %s385_s23 = sand.u32 (!%p345_p9), 1, %s1924_s20   ;;  %s1555_s30 = scalar_lea.hbm (!%p345_p9), %s2907_s11, %s2021_s5 }
  0x13   : > { %s1559_s14 = sshll.u32 (!%p345_p9), %s1555_s30, 4  ;;  %s1560_s14 = int_to_ptr.hbm [resolvable:$true] %s1559_s14 }
  0x15   : > { %v415_v0 = vld [vmem:[%s2897_s1 + $0x18] sm:$0x7]  ;;  %vm469_vm0 = vcmask 1042432   ;;  %v414_v1 = vld [vmem:[%s2897_s1 + $0x10] sm:$0xff]  ;;  %v413_v2 = vld [vmem:[%s2897_s1 + $0x8] sm:$0xff]  ;;  %s2059_s17 = scalar_select %p387_p10, %s2021_s5, 1 }
  0x16   : > { %1645 = vmatpush.msk.msra.mxu0 %vm469_vm0, %v415_v0  ;;  %v412_v3 = vld [vmem:[%s2897_s1] sm:$0xff]  ;;  %vm420_vm1 = vcmask 220160   ;;  %v557_v16 = vld [vmem:[%s2899_s3 + $0x18] sm:$0xff]  ;;  %v556_v17 = vld [vmem:[%s2899_s3 + $0x10] sm:$0xff]  ;;  %vm562_vm2 = vcmask 261120   ;;  %vm724_vm3 = vcmask 31744  }
  0x17   : > { %s1717_s25 = sshll.u32 %s2059_s17, 7  ;;  %623 = vmatpush.msra.mxu1 %v557_v16  ;;  %v555_v19 = vld [vmem:[%s2899_s3 + $0x8] sm:$0xff]  ;;  %v554_v20 = vld [vmem:[%s2899_s3] sm:$0xff]  ;;  %vm1286_vm8 = vcmask 523264   ;;  %vm1381_vm9 = vcmask 1040384   ;;  %vm1383_vm10 = vcmask 1042434  }
  0x18   : > { %486 = vmatpush.msra.mxu0 %v414_v1  ;;  %s2068_s12 = scalar_lea.vmem %s2896_s0, %s1717_s25  ;;  %v2117_v24 = vld [vmem:[%s2898_s2] ss:$0 sm:$0xff]  ;;  %vm1385_vm11 = vcmask 1041408   ;;  %s1890_s25 = scalar_lea.hbm %s2907_s11, 2 }
  0x19   : > { %v396_v4 = vld [vmem:[%s2068_s12] sm:$0xff]  ;;  %v397_v5 = vld [vmem:[%s2068_s12 + $0x8] sm:$0xff]  ;;  %v398_v6 = vld [vmem:[%s2068_s12 + $0x10] sm:$0xff]  ;;  %624 = vmatpush.msra.mxu1 %v556_v17 }
  0x1a   : > { %487 = vmatpush.msra.mxu0 %v413_v2  ;;  %v399_v7 = vld [vmem:[%s2068_s12 + $0x18] sm:$0xff]  ;;  %v400_v8 = vld [vmem:[%s2068_s12 + $0x20] sm:$0xff]  ;;  %v401_v9 = vld [vmem:[%s2068_s12 + $0x28] sm:$0xff] }
  0x1b   : > { %v402_v10 = vld [vmem:[%s2068_s12 + $0x30] sm:$0xff]  ;;  %v403_v11 = vld [vmem:[%s2068_s12 + $0x38] sm:$0xff]  ;;  %v404_v12 = vld [vmem:[%s2068_s12 + $0x40] sm:$0xff]  ;;  %625 = vmatpush.msra.mxu1 %v555_v19 }
  0x1c   : > { %488 = vmatpush.msra.mxu0 %v412_v3  ;;  %v405_v13 = vld [vmem:[%s2068_s12 + $0x48] sm:$0xff]  ;;  %v406_v14 = vld [vmem:[%s2068_s12 + $0x50] sm:$0xff]  ;;  %v407_v15 = vld [vmem:[%s2068_s12 + $0x58] sm:$0xff] }
  0x1d   : > { %1646 = vmatmul.msk.f32.vlgmr.msra.gmra.mxu0 %vm420_vm1, %v396_v4  ;;  %v408_v18 = vld [vmem:[%s2068_s12 + $0x60] sm:$0xff]  ;;  %626 = vmatpush.msra.mxu1 %v554_v20  ;;  %v409_v21 = vld [vmem:[%s2068_s12 + $0x68] sm:$0xff]  ;;  %v410_v22 = vld [vmem:[%s2068_s12 + $0x70] sm:$0xff] }
  0x1e   : > { %v411_v23 = vld [vmem:[%s2068_s12 + $0x78] sm:$0xff]  ;;  %v1801_v20 = vld [vmem:[%s2900_s4] ss:$0 sm:$0xff]  ;;  %s1644_s12 = sshll.u32 %s2059_s17, 2 }
  0x25   : > { %1647 = vmatmul.msk.f32.gmra.mxu0 %vm420_vm1, %v397_v5 }
  0x2d   : > { %1648 = vmatmul.msk.f32.gmra.mxu0 %vm420_vm1, %v398_v6 }
  0x35   : > { %1649 = vmatmul.msk.f32.gmra.mxu0 %vm420_vm1, %v399_v7 }
  0x3d   : > { %1650 = vmatmul.msk.f32.gmra.mxu0 %vm420_vm1, %v400_v8 }
  0x45   : > { %1651 = vmatmul.msk.f32.gmra.mxu0 %vm420_vm1, %v401_v9 }
  0x4d   : > { %1652 = vmatmul.msk.f32.gmra.mxu0 %vm420_vm1, %v402_v10 }
  0x55   : > { %1653 = vmatmul.msk.f32.gmra.mxu0 %vm420_vm1, %v403_v11 }
  0x5d   : > { %1654 = vmatmul.msk.f32.gmra.mxu0 %vm420_vm1, %v404_v12 }
  0x65   : > { %1655 = vmatmul.msk.f32.gmra.mxu0 %vm420_vm1, %v405_v13 }
  0x6d   : > { %1656 = vmatmul.msk.f32.gmra.mxu0 %vm420_vm1, %v406_v14 }
  0x75   : > { %1657 = vmatmul.msk.f32.gmra.mxu0 %vm420_vm1, %v407_v15 }
  0x7d   : > { %1658 = vmatmul.msk.f32.gmra.mxu0 %vm420_vm1, %v408_v18 }
  0x85   : > { %1659 = vmatmul.msk.f32.gmra.mxu0 %vm420_vm1, %v409_v21 }
  0x8d   : > { %1660 = vmatmul.msk.f32.gmra.mxu0 %vm420_vm1, %v410_v22 }
  0x95   : > { %1661 = vmatmul.msk.f32.gmra.mxu0 %vm420_vm1, %v411_v23 }
  0x9a   : > { %v490_v25 = vpop.f32.mrf.mxu0 }
  0x9b   : > { %v2120_v26 = vadd.f32 %v2117_v24, %v490_v25 }
  0x9d   : > { %v538_v27 = vmax.f32 %v2120_v26, 0.0 }
  0x9f   : > { %1662 = vmatmul.msk.f32.vlgmr.msra.gmra.mxu1 %vm562_vm2, %v538_v27 }
  0xa2   : > { %v493_v28 = vpop.f32.mrf.mxu0 }
  0xa3   : > { %v2127_v29 = vadd.f32 %v2117_v24, %v493_v28 }
  0xa5   : > { %v539_v30 = vmax.f32 %v2127_v29, 0.0 }
  0xa7   : > { %1663 = vmatmul.msk.f32.gmra.mxu1 %vm562_vm2, %v539_v30 }
  0xaa   : > { %v496_v31 = vpop.f32.mrf.mxu0 }
  0xab   : > { %v2134_v32 = vadd.f32 %v2117_v24, %v496_v31 }
  0xad   : > { %v540_v33 = vmax.f32 %v2134_v32, 0.0 }
  0xaf   : > { %1664 = vmatmul.msk.f32.gmra.mxu1 %vm562_vm2, %v540_v33 }
  0xb2   : > { %v499_v34 = vpop.f32.mrf.mxu0 }
  0xb3   : > { %v2141_v35 = vadd.f32 %v2117_v24, %v499_v34 }
  0xb5   : > { %v541_v36 = vmax.f32 %v2141_v35, 0.0 }
  0xb7   : > { %1665 = vmatmul.msk.f32.gmra.mxu1 %vm562_vm2, %v541_v36 }
  0xba   : > { %v502_v37 = vpop.f32.mrf.mxu0 }
  0xbb   : > { %v2148_v38 = vadd.f32 %v2117_v24, %v502_v37 }
  0xbd   : > { %v542_v39 = vmax.f32 %v2148_v38, 0.0 }
  0xbf   : > { %1666 = vmatmul.msk.f32.gmra.mxu1 %vm562_vm2, %v542_v39 }
  0xc2   : > { %v505_v40 = vpop.f32.mrf.mxu0 }
  0xc3   : > { %v2155_v41 = vadd.f32 %v2117_v24, %v505_v40 }
  0xc5   : > { %v543_v42 = vmax.f32 %v2155_v41, 0.0 }
  0xc7   : > { %1667 = vmatmul.msk.f32.gmra.mxu1 %vm562_vm2, %v543_v42 }
  0xca   : > { %v508_v43 = vpop.f32.mrf.mxu0 }
  0xcb   : > { %v2162_v44 = vadd.f32 %v2117_v24, %v508_v43 }
  0xcd   : > { %v544_v45 = vmax.f32 %v2162_v44, 0.0 }
  0xcf   : > { %1668 = vmatmul.msk.f32.gmra.mxu1 %vm562_vm2, %v544_v45 }
  0xd2   : > { %v511_v46 = vpop.f32.mrf.mxu0 }
  0xd3   : > { %v2169_v47 = vadd.f32 %v2117_v24, %v511_v46 }
  0xd5   : > { %v545_v48 = vmax.f32 %v2169_v47, 0.0 }
  0xd7   : > { %1669 = vmatmul.msk.f32.gmra.mxu1 %vm562_vm2, %v545_v48 }
  0xda   : > { %v514_v49 = vpop.f32.mrf.mxu0 }
  0xdb   : > { %v2176_v50 = vadd.f32 %v2117_v24, %v514_v49 }
  0xdd   : > { %v546_v51 = vmax.f32 %v2176_v50, 0.0 }
  0xdf   : > { %1670 = vmatmul.msk.f32.gmra.mxu1 %vm562_vm2, %v546_v51 }
  0xe2   : > { %v517_v52 = vpop.f32.mrf.mxu0 }
  0xe3   : > { %v2183_v53 = vadd.f32 %v2117_v24, %v517_v52 }
  0xe5   : > { %v547_v54 = vmax.f32 %v2183_v53, 0.0 }
  0xe7   : > { %1671 = vmatmul.msk.f32.gmra.mxu1 %vm562_vm2, %v547_v54 }
  0xea   : > { %v520_v55 = vpop.f32.mrf.mxu0 }
  0xeb   : > { %v2190_v56 = vadd.f32 %v2117_v24, %v520_v55 }
  0xed   : > { %v548_v57 = vmax.f32 %v2190_v56, 0.0 }
  0xef   : > { %1672 = vmatmul.msk.f32.gmra.mxu1 %vm562_vm2, %v548_v57 }
  0xf2   : > { %v523_v58 = vpop.f32.mrf.mxu0 }
  0xf3   : > { %v2197_v59 = vadd.f32 %v2117_v24, %v523_v58 }
  0xf5   : > { %v549_v60 = vmax.f32 %v2197_v59, 0.0 }
  0xf7   : > { %1673 = vmatmul.msk.f32.gmra.mxu1 %vm562_vm2, %v549_v60 }
  0xfa   : > { %v526_v61 = vpop.f32.mrf.mxu0 }
  0xfb   : > { %v2204_v62 = vadd.f32 %v2117_v24, %v526_v61 }
  0xfd   : > { %v550_v63 = vmax.f32 %v2204_v62, 0.0 }
  0xff   : > { %1674 = vmatmul.msk.f32.gmra.mxu1 %vm562_vm2, %v550_v63 }
 0x102   : > { %v529_v0 = vpop.f32.mrf.mxu0 }
 0x103   : > { %v2211_v1 = vadd.f32 %v2117_v24, %v529_v0 }
 0x105   : > { %v551_v2 = vmax.f32 %v2211_v1, 0.0  ;;  %v1265_v1 = vld [vmem:[%s2902_s6 + $0xa8] sm:$0xff] }
 0x107   : > { %1675 = vmatmul.msk.f32.gmra.mxu1 %vm562_vm2, %v551_v2 }
 0x10a   : > { %v532_v3 = vpop.f32.mrf.mxu0 }
 0x10b   : > { %v2218_v4 = vadd.f32 %v2117_v24, %v532_v3 }
 0x10d   : > { %v552_v5 = vmax.f32 %v2218_v4, 0.0 }
 0x10f   : > { %1676 = vmatmul.msk.f32.gmra.mxu1 %vm562_vm2, %v552_v5 }
 0x112   : > { %v535_v6 = vpop.f32.mrf.mxu0 }
 0x113   : > { %v2225_v7 = vadd.f32 %v2117_v24, %v535_v6 }
 0x115   : > { %v553_v8 = vmax.f32 %v2225_v7, 0.0  ;;  %v1266_v7 = vld [vmem:[%s2902_s6 + $0xb0] sm:$0xff] }
 0x117   : > { %1677 = vmatmul.msk.f32.gmra.mxu1 %vm562_vm2, %v553_v8 }
 0x11c   : > { %v628_v9 = vpop.f32.mrf.mxu1 }
 0x124   : > { %v631_v10 = vpop.f32.mrf.mxu1 }
 0x125   : > { %v2262_v52 = vadd.f32 %v1801_v20, %v631_v10 }
 0x12c   : > { %v634_v11 = vpop.f32.mrf.mxu1 }
 0x12d   : > { %v2281_v0 = vadd.f32 %v1801_v20, %v634_v11 }
 0x134   : > { %v637_v12 = vpop.f32.mrf.mxu1 }
 0x135   : > { %v2296_v11 = vadd.f32 %v1801_v20, %v637_v12 }
 0x13c   : > { %v640_v13 = vpop.f32.mrf.mxu1 }
 0x13d   : > { %v2250_v37 = vadd.f32 %v1801_v20, %v640_v13  ;;  %v2300_v13 = vadd.f32 %v1801_v20, %v628_v9 }
 0x144   : > { %v643_v14 = vpop.f32.mrf.mxu1 }
 0x145   : > { %v2270_v55 = vadd.f32 %v1801_v20, %v643_v14 }
 0x14c   : > { %v646_v15 = vpop.f32.mrf.mxu1 }
 0x14d   : > { %v2289_v6 = vadd.f32 %v1801_v20, %v646_v15 }
 0x154   : > { %v649_v16 = vpop.f32.mrf.mxu1 }
 0x155   : > { %v2242_v28 = vadd.f32 %v1801_v20, %v649_v16 }
 0x157   : > { %v1775_v12 = vpack.i.bf16 %v2289_v6, %v2242_v28 }
 0x15c   : > { %v652_v17 = vpop.f32.mrf.mxu1 }
 0x15d   : > { %v2258_v46 = vadd.f32 %v1801_v20, %v652_v17 }
 0x164   : > { %v655_v18 = vpop.f32.mrf.mxu1 }
 0x165   : > { %v2283_v3 = vadd.f32 %v1801_v20, %v655_v18 }
 0x167   : > { %v1770_v15 = vpack.i.bf16 %v2258_v46, %v2283_v3 }
 0x16c   : > { %v658_v19 = vpop.f32.mrf.mxu1 }
 0x16d   : > { %v2238_v24 = vadd.f32 %v1801_v20, %v658_v19 }
 0x174   : > { %v661_v21 = vpop.f32.mrf.mxu1 }
 0x175   : > { %v2234_v22 = vadd.f32 %v1801_v20, %v661_v21 }
 0x177   : > { %714 = vrot.lane.b32.xlu2 %v2234_v22, %s1934_s15  ;;  %v1765_v61 = vpack.i.bf16 %v2238_v24, %v2234_v22 }
 0x17c   : > { %v664_v23 = vpop.f32.mrf.mxu1 }
 0x17d   : > { %v2252_v40 = vadd.f32 %v1801_v20, %v664_v23 }
 0x17f   : > { %712 = vrot.lane.b32.xlu2 %v2238_v24, %s1934_s15 }
 0x184   : > { %v667_v25 = vpop.f32.mrf.mxu1 }
 0x185   : > { %v2244_v31 = vadd.f32 %v1801_v20, %v667_v25 }
 0x187   : > { %718 = vrot.lane.b32.xlu1 %v2244_v31, %s1934_s15  ;;  %706 = vrot.lane.b32.xlu2 %v2242_v28, %s1934_s15  ;;  %v1760_v14 = vpack.i.bf16 %v2252_v40, %v2244_v31 }
 0x18c   : > { %v670_v34 = vpop.f32.mrf.mxu1 }
 0x18d   : > { %v2272_v58 = vadd.f32 %v1801_v20, %v670_v34 }
 0x18f   : > { %716 = vrot.lane.b32.xlu1 %v2252_v40, %s1934_s15  ;;  %700 = vrot.lane.b32.xlu2 %v2250_v37, %s1934_s15 }
 0x194   : > { %v673_v43 = vpop.f32.mrf.mxu1 }
 0x195   : > { %v2260_v49 = vadd.f32 %v1801_v20, %v673_v43 }
 0x197   : > { %722 = vrot.lane.b32.xlu0 %v2260_v49, %s1934_s15  ;;  %708 = vrot.lane.b32.xlu1 %v2258_v46, %s1934_s15  ;;  %v1780_v10 = vpack.i.bf16 %v2272_v58, %v2260_v49 }
 0x198   : > { %694 = vrot.lane.b32.xlu2 %v2262_v52, %s1934_s15 }
 0x19f   : > { %720 = vrot.lane.b32.xlu0 %v2272_v58, %s1934_s15  ;;  %702 = vrot.lane.b32.xlu1 %v2270_v55, %s1934_s15 }
 0x1a0   : > { %1766 = vrot.lane.b32.xlu2 %v1765_v61, %s1935_s16 }
 0x1a7   : > { %710 = vrot.lane.b32.xlu0 %v2283_v3, %s1934_s15  ;;  %696 = vrot.lane.b32.xlu1 %v2281_v0, %s1934_s15 }
 0x1af   : > { %704 = vrot.lane.b32.xlu0 %v2289_v6, %s1934_s15  ;;  %1781 = vrot.lane.b32.xlu1 %v1780_v10, %s1935_s16 }
 0x1b7   : > { %698 = vrot.lane.b32.xlu0 %v2296_v11, %s1934_s15 }
 0x1bf   : > { %692 = vrot.lane.b32.xlu0 %v2300_v13, %s1934_s15  ;;  %s1544_s15 = scalar_lea.sflag [#allocation4], %s385_s23 }
 0x1c7   : > { %1761 = vrot.lane.b32.xlu0 %v1760_v14, %s1935_s16 }
 0x1cf   : > { %1771 = vrot.lane.b32.xlu0 %v1770_v15, %s1935_s16 }
 0x1d1   : > { %v715_v17 = vpop.permute.xlu2 %714 }
 0x1d7   : > { %1776 = vrot.lane.b32.xlu0 %v1775_v12, %s1935_s16 }
 0x1d9   : > { %v713_v23 = vpop.permute.xlu2 %712 }
 0x1e1   : > { %v707_v43 = vpop.permute.xlu2 %706 }
 0x1e9   : > { %v701_v12 = vpop.permute.xlu2 %700 }
 0x1f9   : > { %v719_v9 = vpop.permute.xlu1 %718 }
 0x201   : > { %v717_v16 = vpop.permute.xlu1 %716 }
 0x209   : > { %v723_v18 = vpop.permute.xlu0 %722  ;;  %v709_v19 = vpop.permute.xlu1 %708 }
 0x20a   : > { %1678 = vmatpush.xpose.msk.msra.mxu2 %vm724_vm3, %v723_v18 }
 0x211   : > { %v721_v20 = vpop.permute.xlu0 %720  ;;  %v703_v21 = vpop.permute.xlu1 %702 }
 0x212   : > { %1679 = vmatpush.xpose.msk.msra.mxu2 %vm724_vm3, %v721_v20 }
 0x216   : > { %1680 = vmatpush.xpose.msk.msra.mxu2 %vm724_vm3, %v719_v9  ;;  %v695_v9 = vpop.permute.xlu2 %694 }
 0x219   : > { %v711_v25 = vpop.permute.xlu0 %710  ;;  %v697_v34 = vpop.permute.xlu1 %696 }
 0x21a   : > { %1681 = vmatpush.xpose.msk.msra.mxu2 %vm724_vm3, %v717_v16 }
 0x21e   : > { %1682 = vmatpush.xpose.msk.msra.mxu2 %vm724_vm3, %v715_v17 }
 0x221   : > { %v705_v61 = vpop.permute.xlu0 %704  ;;  %v1782_v10 = vpop.permute.xlu1 %1781 }
 0x222   : > { %1683 = vmatpush.xpose.msk.msra.mxu2 %vm724_vm3, %v713_v23  ;;  %v1783_v14 = vunpack.i.l.bf16 %v1782_v10  ;;  %v1784_v15 = vunpack.i.h.bf16 %v1782_v10  ;;  %v1767_v23 = vpop.permute.xlu2 %1766 }
 0x223   : > { %v1768_v10 = vunpack.i.l.bf16 %v1767_v23 }
 0x224   : > { %1046 = vmatpush.msra.mxu3 %v1783_v14 }
 0x226   : > { %1684 = vmatpush.xpose.msk.msra.mxu2 %vm724_vm3, %v711_v25  ;;  %1047 = vmatpush.msra.mxu3 %v1784_v15 }
 0x229   : > { %v699_v18 = vpop.permute.xlu0 %698 }
 0x22a   : > { %1685 = vmatpush.xpose.msk.msra.mxu2 %vm724_vm3, %v709_v19  ;;  %v1769_v19 = vunpack.i.h.bf16 %v1767_v23 }
 0x22e   : > { %1686 = vmatpush.xpose.msk.msra.mxu2 %vm724_vm3, %v707_v43 }
 0x231   : > { %v693_v16 = vpop.permute.xlu0 %692 }
 0x232   : > { %1687 = vmatpush.xpose.msk.msra.mxu2 %vm724_vm3, %v705_v61 }
 0x236   : > { %1688 = vmatpush.xpose.msk.msra.mxu2 %vm724_vm3, %v703_v21 }
 0x239   : > { %v1762_v17 = vpop.permute.xlu0 %1761 }
 0x23a   : > { %1689 = vmatpush.xpose.msk.msra.mxu2 %vm724_vm3, %v701_v12  ;;  %v1763_v20 = vunpack.i.l.bf16 %v1762_v17  ;;  %v1764_v25 = vunpack.i.h.bf16 %v1762_v17 }
 0x23c   : > { %1048 = vmatpush.msra.mxu3 %v1763_v20 }
 0x23e   : > { %1690 = vmatpush.xpose.msk.msra.mxu2 %vm724_vm3, %v699_v18  ;;  %1049 = vmatpush.msra.mxu3 %v1764_v25 }
 0x240   : > { %1050 = vmatpush.msra.mxu3 %v1768_v10 }
 0x241   : > { %v1772_v43 = vpop.permute.xlu0 %1771 }
 0x242   : > { %1691 = vmatpush.xpose.msk.msra.mxu2 %vm724_vm3, %v697_v34  ;;  %1051 = vmatpush.msra.mxu3 %v1769_v19  ;;  %v1773_v61 = vunpack.i.l.bf16 %v1772_v43  ;;  %v1774_v21 = vunpack.i.h.bf16 %v1772_v43  ;;  %v1795_v34 = vpack.i.bf16 %v2300_v13, %v2262_v52 }
 0x244   : > { %1052 = vmatpush.msra.mxu3 %v1773_v61 }
 0x246   : > { %1692 = vmatpush.xpose.msk.msra.mxu2 %vm724_vm3, %v695_v9  ;;  %1053 = vmatpush.msra.mxu3 %v1774_v21 }
 0x249   : > { %v1777_v14 = vpop.permute.xlu0 %1776 }
 0x24a   : > { %1693 = vmatpush.xpose.msk.msra.mxu2 %vm724_vm3, %v693_v16  ;;  %v1778_v15 = vunpack.i.l.bf16 %v1777_v14  ;;  %v1779_v12 = vunpack.i.h.bf16 %v1777_v14 }
 0x24c   : > { %1054 = vmatpush.msra.mxu3 %v1778_v15 }
 0x24d   : > { %1694 = vmatmul.msk.f32.vlgmr.msra.gmra.mxu2 %vm724_vm3, %v2300_v13 }
 0x24e   : > { %1055 = vmatpush.msra.mxu3 %v1779_v12 }
 0x255   : > { %1695 = vmatmul.msk.f32.gmra.mxu2 %vm724_vm3, %v2262_v52 }
 0x25d   : > { %1696 = vmatmul.msk.f32.gmra.mxu2 %vm724_vm3, %v2281_v0 }
 0x265   : > { %1697 = vmatmul.msk.f32.gmra.mxu2 %vm724_vm3, %v2296_v11 }
 0x26d   : > { %1698 = vmatmul.msk.f32.gmra.mxu2 %vm724_vm3, %v2250_v37 }
 0x275   : > { %1699 = vmatmul.msk.f32.gmra.mxu2 %vm724_vm3, %v2270_v55 }
 0x27d   : > { %1700 = vmatmul.msk.f32.gmra.mxu2 %vm724_vm3, %v2289_v6  ;;  %v1790_v6 = vpack.i.bf16 %v2281_v0, %v2296_v11 }
 0x285   : > { %1701 = vmatmul.msk.f32.gmra.mxu2 %vm724_vm3, %v2242_v28 }
 0x28d   : > { %1702 = vmatmul.msk.f32.gmra.mxu2 %vm724_vm3, %v2258_v46 }
 0x295   : > { %1703 = vmatmul.msk.f32.gmra.mxu2 %vm724_vm3, %v2283_v3 }
 0x29d   : > { %1704 = vmatmul.msk.f32.gmra.mxu2 %vm724_vm3, %v2238_v24 }
 0x2a5   : > { %1705 = vmatmul.msk.f32.gmra.mxu2 %vm724_vm3, %v2234_v22 }
 0x2ad   : > { %1706 = vmatmul.msk.f32.gmra.mxu2 %vm724_vm3, %v2252_v40  ;;  %v1785_v40 = vpack.i.bf16 %v2250_v37, %v2270_v55 }
 0x2b5   : > { %1707 = vmatmul.msk.f32.gmra.mxu2 %vm724_vm3, %v2244_v31 }
 0x2bd   : > { %1708 = vmatmul.msk.f32.gmra.mxu2 %vm724_vm3, %v2272_v58 }
 0x2c5   : > { %1709 = vmatmul.msk.f32.gmra.mxu2 %vm724_vm3, %v2260_v49 }
 0x2d0   : > { %v806_v28 = vpop.f32.mrf.mxu2 }
 0x2d1   : > { %854 = vmax.xlane.f32.xlu1 %v806_v28 }
 0x2d8   : > { %v809_v46 = vpop.f32.mrf.mxu2 }
 0x2d9   : > { %856 = vmax.xlane.f32.xlu2 %v809_v46 }
 0x2e0   : > { %v812_v24 = vpop.f32.mrf.mxu2 }
 0x2e1   : > { %858 = vmax.xlane.f32.xlu0 %v812_v24 }
 0x2e8   : > { %v815_v3 = vpop.f32.mrf.mxu2 }
 0x2e9   : > { %860 = vmax.xlane.f32.xlu2 %v815_v3 }
 0x2f0   : > { %v818_v22 = vpop.f32.mrf.mxu2 }
 0x2f1   : > { %862 = vmax.xlane.f32.xlu2 %v818_v22 }
 0x2f5   : > { %1786 = vrot.lane.b32.xlu0 %v1785_v40, %s1935_s16 }
 0x2f8   : > { %v821_v31 = vpop.f32.mrf.mxu2 }
 0x2f9   : > { %864 = vmax.xlane.f32.xlu1 %v821_v31 }
 0x300   : > { %v824_v58 = vpop.f32.mrf.mxu2 }
 0x301   : > { %866 = vmax.xlane.f32.xlu2 %v824_v58 }
 0x308   : > { %v2364_v49 = vpop.f32.mrf.mxu2 }
 0x309   : > { %868 = vmax.xlane.f32.xlu2 %v2364_v49 }
 0x310   : > { %v2373_v37 = vpop.f32.mrf.mxu2 }
 0x312   : > { %1791 = vrot.lane.b32.xlu1 %v1790_v6, %s1935_s16 }
 0x318   : > { %v2375_v55 = vpop.f32.mrf.mxu2 }
 0x320   : > { %v2377_v16 = vpop.f32.mrf.mxu2 }
 0x321   : > { %1796 = vrot.lane.b32.xlu2 %v1795_v34, %s1935_s16  ;;  %s395_s16 = scalar_lea.vmem %s2906_s10, %s1644_s12 }
 0x328   : > { %v2382_v52 = vpop.f32.mrf.mxu2 }
 0x330   : > { %v2388_v19 = vpop.f32.mrf.mxu2 }
 0x338   : > { %v2391_v15 = vpop.f32.mrf.mxu2 }
 0x344   : > { %v855_v18 = vpop.xlane.xlu1 %854 }
 0x345   : > { %v886_v9 = vsub.f32 %v806_v28, %v855_v18 }
 0x347   : > { %v902_v17 = vmul.f32 1.442695, %v886_v9 }
 0x349   : > { %1802 = vpow2.f32 %v902_v17  ;;  %v2399_v17 = vpop.f32.mrf.mxu2 }
 0x34c   : > { %v857_v20 = vpop.xlane.xlu2 %856 }
 0x34d   : > { %v887_v23 = vsub.f32 %v809_v46, %v857_v20 }
 0x34f   : > { %v2379_v0 = vpop.eup %1802  ;;  %v904_v11 = vmul.f32 1.442695, %v887_v23 }
 0x350   : > { %934 = vadd.xlane.f32.xlu0 %v2379_v0 }
 0x351   : > { %1804 = vpow2.f32 %v904_v11 }
 0x354   : > { %v859_v13 = vpop.xlane.xlu0 %858 }
 0x355   : > { %v888_v10 = vsub.f32 %v812_v24, %v859_v13 }
 0x357   : > { %v2384_v25 = vpop.eup %1804  ;;  %v906_v43 = vmul.f32 1.442695, %v888_v10 }
 0x358   : > { %936 = vadd.xlane.f32.xlu1 %v2384_v25  ;;  %870 = vmax.xlane.f32.xlu0 %v2373_v37 }
 0x359   : > { %1806 = vpow2.f32 %v906_v43 }
 0x35c   : > { %v861_v61 = vpop.xlane.xlu2 %860 }
 0x35d   : > { %v889_v21 = vsub.f32 %v815_v3, %v861_v61 }
 0x35f   : > { %v908_v14 = vmul.f32 1.442695, %v889_v21  ;;  %v2393_v28 = vpop.eup %1806 }
 0x360   : > { %872 = vmax.xlane.f32.xlu0 %v2375_v55 }
 0x361   : > { %1808 = vpow2.f32 %v908_v14 }
 0x364   : > { %v863_v12 = vpop.xlane.xlu2 %862 }
 0x365   : > { %v890_v40 = vsub.f32 %v818_v22, %v863_v12 }
 0x367   : > { %v2395_v46 = vpop.eup %1808  ;;  %v1787_v24 = vpop.permute.xlu0 %1786  ;;  %v910_v34 = vmul.f32 1.442695, %v890_v40 }
 0x368   : > { %940 = vadd.xlane.f32.xlu2 %v2395_v46  ;;  %938 = vadd.xlane.f32.xlu0 %v2393_v28  ;;  %v1788_v6 = vunpack.i.l.bf16 %v1787_v24  ;;  %v1789_v3 = vunpack.i.h.bf16 %v1787_v24 }
 0x369   : > { %1810 = vpow2.f32 %v910_v34 }
 0x36a   : > { %1056 = vmatpush.msra.mxu3 %v1788_v6 }
 0x36c   : > { %v865_v18 = vpop.xlane.xlu1 %864  ;;  %1057 = vmatpush.msra.mxu3 %v1789_v3  ;;  %v2418_v3 = vpop.f32.mrf.mxu2 }
 0x36d   : > { %v891_v9 = vsub.f32 %v821_v31, %v865_v18 }
 0x36f   : > { %v912_v20 = vmul.f32 1.442695, %v891_v9  ;;  %v2403_v11 = vpop.eup %1810 }
 0x370   : > { %882 = vmax.xlane.f32.xlu2 %v2399_v17  ;;  %874 = vmax.xlane.f32.xlu0 %v2377_v16 }
 0x371   : > { %1812 = vpow2.f32 %v912_v20 }
 0x374   : > { %v867_v22 = vpop.xlane.xlu2 %866 }
 0x375   : > { %v892_v23 = vsub.f32 %v824_v58, %v867_v22 }
 0x377   : > { %v2405_v13 = vpop.eup %1812  ;;  %v914_v10 = vmul.f32 1.442695, %v892_v23 }
 0x378   : > { %944 = vadd.xlane.f32.xlu1 %v2405_v13  ;;  %942 = vadd.xlane.f32.xlu0 %v2403_v11 }
 0x379   : > { %1814 = vpow2.f32 %v914_v10 }
 0x37c   : > { %v869_v31 = vpop.xlane.xlu2 %868 }
 0x37d   : > { %v893_v43 = vsub.f32 %v2364_v49, %v869_v31 }
 0x37f   : > { %v2410_v61 = vpop.eup %1814  ;;  %v916_v21 = vmul.f32 1.442695, %v893_v43 }
 0x380   : > { %946 = vadd.xlane.f32.xlu1 %v2410_v61  ;;  %876 = vmax.xlane.f32.xlu0 %v2382_v52 }
 0x381   : > { %1816 = vpow2.f32 %v916_v21 }
 0x384   : > { %v1792_v58 = vpop.permute.xlu1 %1791  ;;  %v1797_v12 = vpop.permute.xlu2 %1796 }
 0x385   : > { %v1793_v14 = vunpack.i.l.bf16 %v1792_v58  ;;  %v1794_v40 = vunpack.i.h.bf16 %v1792_v58  ;;  %v1798_v49 = vunpack.i.l.bf16 %v1797_v12  ;;  %v1799_v6 = vunpack.i.h.bf16 %v1797_v12 }
 0x387   : > { %v2414_v24 = vpop.eup %1816  ;;  %1058 = vmatpush.msra.mxu3 %v1793_v14 }
 0x388   : > { %948 = vadd.xlane.f32.xlu1 %v2414_v24  ;;  %878 = vmax.xlane.f32.xlu0 %v2388_v19 }
 0x389   : > { %1059 = vmatpush.msra.mxu3 %v1794_v40 }
 0x38b   : > { %1060 = vmatpush.msra.mxu3 %v1798_v49 }
 0x38d   : > { %1061 = vmatpush.msra.mxu3 %v1799_v6 }
 0x390   : > { %884 = vmax.xlane.f32.xlu1 %v2418_v3  ;;  %880 = vmax.xlane.f32.xlu0 %v2391_v15 }
 0x3c3   : > { %v935_v34 = vpop.xlane.xlu0 %934 }
 0x3c4   : > { %1818 = vrcp.f32 %v935_v34 }
 0x3ca   : > { %v1819_v18 = vpop.eup %1818 }
 0x3cb   : > { %v937_v9 = vpop.xlane.xlu1 %936  ;;  %v871_v20 = vpop.xlane.xlu0 %870  ;;  %v982_v22 = vmul.f32 %v1819_v18, %v2379_v0 }
 0x3cc   : > { %1820 = vrcp.f32 %v937_v9  ;;  %v894_v23 = vsub.f32 %v2373_v37, %v871_v20 }
 0x3cd   : > { %1062 = vmatmul.f32.vlgmr.msra.gmra.mxu3 %v982_v22 }
 0x3ce   : > { %v918_v10 = vmul.f32 1.442695, %v894_v23 }
 0x3d0   : > { %1822 = vpow2.f32 %v918_v10 }
 0x3d2   : > { %v1821_v31 = vpop.eup %1820 }
 0x3d3   : > { %v873_v43 = vpop.xlane.xlu0 %872  ;;  %v983_v21 = vmul.f32 %v1821_v31, %v2384_v25 }
 0x3d4   : > { %v895_v58 = vsub.f32 %v2375_v55, %v873_v43 }
 0x3d5   : > { %1065 = vmatmul.f32.gmra.mxu3 %v983_v21 }
 0x3d6   : > { %v2426_v14 = vpop.eup %1822  ;;  %v920_v12 = vmul.f32 1.442695, %v895_v58 }
 0x3d7   : > { %950 = vadd.xlane.f32.xlu0 %v2426_v14 }
 0x3d8   : > { %1824 = vpow2.f32 %v920_v12 }
 0x3db   : > { %v939_v0 = vpop.xlane.xlu0 %938  ;;  %v941_v37 = vpop.xlane.xlu2 %940 }
 0x3dc   : > { %1826 = vrcp.f32 %v939_v0 }
 0x3dd   : > { %1828 = vrcp.f32 %v941_v37 }
 0x3de   : > { %v2429_v40 = vpop.eup %1824 }
 0x3df   : > { %952 = vadd.xlane.f32.xlu2 %v2429_v40 }
 0x3e2   : > { %v1827_v49 = vpop.eup %1826 }
 0x3e3   : > { %v875_v6 = vpop.xlane.xlu0 %874  ;;  %v984_v55 = vmul.f32 %v1827_v49, %v2393_v28  ;;  %v1829_v18 = vpop.eup %1828 }
 0x3e4   : > { %v896_v25 = vsub.f32 %v2377_v16, %v875_v6  ;;  %v985_v22 = vmul.f32 %v1829_v18, %v2395_v46  ;;  %v883_v43 = vpop.xlane.xlu2 %882 }
 0x3e5   : > { %1068 = vmatmul.f32.gmra.mxu3 %v984_v55  ;;  %v900_v12 = vsub.f32 %v2399_v17, %v883_v43 }
 0x3e6   : > { %v922_v34 = vmul.f32 1.442695, %v896_v25 }
 0x3e7   : > { %v930_v0 = vmul.f32 1.442695, %v900_v12 }
 0x3e8   : > { %1830 = vpow2.f32 %v922_v34 }
 0x3eb   : > { %v945_v9 = vpop.xlane.xlu1 %944  ;;  %v943_v20 = vpop.xlane.xlu0 %942 }
 0x3ec   : > { %1832 = vrcp.f32 %v943_v20 }
 0x3ed   : > { %1071 = vmatmul.f32.gmra.mxu3 %v985_v22  ;;  %1834 = vrcp.f32 %v945_v9 }
 0x3ee   : > { %v2435_v23 = vpop.eup %1830 }
 0x3ef   : > { %954 = vadd.xlane.f32.xlu0 %v2435_v23 }
 0x3f2   : > { %v1833_v10 = vpop.eup %1832 }
 0x3f3   : > { %v947_v31 = vpop.xlane.xlu1 %946  ;;  %v877_v16 = vpop.xlane.xlu0 %876  ;;  %v986_v21 = vmul.f32 %v1833_v10, %v2403_v11 }
 0x3f4   : > { %v897_v28 = vsub.f32 %v2382_v52, %v877_v16  ;;  %v1835_v46 = vpop.eup %1834 }
 0x3f5   : > { %1074 = vmatmul.f32.gmra.mxu3 %v986_v21  ;;  %v987_v25 = vmul.f32 %v1835_v46, %v2405_v13 }
 0x3f6   : > { %v924_v58 = vmul.f32 1.442695, %v897_v28 }
 0x3f8   : > { %1836 = vpow2.f32 %v924_v58 }
 0x3f9   : > { %1838 = vrcp.f32 %v947_v31 }
 0x3fa   : > { %1840 = vpow2.f32 %v930_v0 }
 0x3fb   : > { %v949_v37 = vpop.xlane.xlu1 %948  ;;  %v879_v49 = vpop.xlane.xlu0 %878 }
 0x3fc   : > { %v898_v6 = vsub.f32 %v2388_v19, %v879_v49 }
 0x3fd   : > { %1077 = vmatmul.f32.gmra.mxu3 %v987_v25 }
 0x3fe   : > { %v2443_v55 = vpop.eup %1836  ;;  %v926_v34 = vmul.f32 1.442695, %v898_v6 }
 0x3ff   : > { %956 = vadd.xlane.f32.xlu1 %v2443_v55  ;;  %v1839_v52 = vpop.eup %1838 }
 0x400   : > { %1842 = vpow2.f32 %v926_v34  ;;  %v988_v19 = vmul.f32 %v1839_v52, %v2410_v61  ;;  %v2449_v20 = vpop.eup %1840  ;;  %v1112_v61 = vstv %s1111_s18 }
 0x401   : > { %1844 = vrcp.f32 %v949_v37  ;;  %v1710_v43 = vmul.f32 -1.442695, %v1112_v61 }
 0x403   : > { %v885_v17 = vpop.xlane.xlu1 %884  ;;  %v881_v11 = vpop.xlane.xlu0 %880 }
 0x404   : > { %v901_v18 = vsub.f32 %v2418_v3, %v885_v17  ;;  %v899_v9 = vsub.f32 %v2391_v15, %v881_v11 }
 0x405   : > { %1080 = vmatmul.f32.gmra.mxu3 %v988_v19 }
 0x406   : > { %v2451_v13 = vpop.eup %1842  ;;  %v932_v22 = vmul.f32 1.442695, %v901_v18  ;;  %v928_v10 = vmul.f32 1.442695, %v899_v9 }
 0x407   : > { %962 = vadd.xlane.f32.xlu1 %v2449_v20  ;;  %958 = vadd.xlane.f32.xlu2 %v2451_v13  ;;  %v1845_v31 = vpop.eup %1844 }
 0x408   : > { %1846 = vpow2.f32 %v932_v22  ;;  %v989_v3 = vmul.f32 %v1845_v31, %v2414_v24 }
 0x409   : > { %1848 = vpow2.f32 %v928_v10 }
 0x40a   : > { %1850 = vpow2.f32 %v1710_v43 }
 0x40d   : > { %1083 = vmatmul.f32.gmra.mxu3 %v989_v3 }
 0x40e   : > { %v2456_v16 = vpop.eup %1846 }
 0x40f   : > { %v2458_v15 = vpop.eup %1848  ;;  %964 = vadd.xlane.f32.xlu2 %v2456_v16 }
 0x410   : > { %960 = vadd.xlane.f32.xlu0 %v2458_v15  ;;  %v1851_v28 = vpop.eup %1850 }
 0x411   : > { %v1116_v21 = vadd.f32 1.0, %v1851_v28 }
 0x413   : > { %1852 = vrcp.f32 %v1116_v21  ;;  %vm1122_vm4 = vweird.f32 %v1116_v21  ;;  %v1128_v37 = vand.u32 2147483648, %v1116_v21  ;;  %v1126_v6 = vand.u32 2147483647, %v1116_v21 }
 0x415   : > { %v1129_v25 = vor.u32 1.1754944e-38, %v1128_v37  ;;  %vm1127_vm7 = vcmp.eq.f32.partialorder %v1126_v6, 8.507059e+37 }
 0x419   : > { %v1853_v58 = vpop.eup %1852 }
 0x41a   : > { %v1118_v12 = vmul.f32 %v1853_v58, %v1116_v21  ;;  %vm1123_vm5 = vweird.f32 %v1853_v58 }
 0x41b   : > { %vm1124_vm6 = vmor %vm1122_vm4, %vm1123_vm5 }
 0x41c   : > { %v1119_v46 = vsub.f32 1.0, %v1118_v12 }
 0x41e   : > { %v1120_v24 = vmul.f32 %v1853_v58, %v1119_v46 }
 0x420   : > { %v1121_v49 = vadd.f32 %v1853_v58, %v1120_v24 }
 0x422   : > { %v1125_v34 = vsel %vm1124_vm6, %v1853_v58, %v1121_v49 }
 0x423   : > { %v2462_v11 = vsel %vm1127_vm7, %v1129_v25, %v1125_v34 }
 0x44a   : > { %v951_v0 = vpop.xlane.xlu0 %950 }
 0x44b   : > { %1854 = vrcp.f32 %v951_v0 }
 0x450   : > { %v1063_v52 = vpop.f32.mrf.mxu3 }
 0x451   : > { %v1855_v17 = vpop.eup %1854  ;;  %v1132_v19 = vmul.f32 %v2462_v11, %v1063_v52 }
 0x452   : > { %v953_v18 = vpop.xlane.xlu2 %952  ;;  %v990_v9 = vmul.f32 %v1855_v17, %v2426_v14 }
 0x453   : > { %1856 = vrcp.f32 %v953_v18  ;;  %v1148_v31 = vadd.f32 %v1132_v19, %v538_v27 }
 0x454   : > { %1086 = vmatmul.f32.gmra.mxu3 %v990_v9 }
 0x455   : > { %v1201_v28 = vsel %vm562_vm2, %v1148_v31, 0.0  ;;  %v1164_v18 = vsel %vm562_vm2, %v1148_v31, -inf }
 0x458   : > { %v1066_v22 = vpop.f32.mrf.mxu3 }
 0x459   : > { %v1857_v10 = vpop.eup %1856  ;;  %v1133_v3 = vmul.f32 %v2462_v11, %v1066_v22 }
 0x45a   : > { %v991_v61 = vmul.f32 %v1857_v10, %v2429_v40 }
 0x45b   : > { %v1149_v43 = vadd.f32 %v1133_v3, %v539_v30 }
 0x45c   : > { %1089 = vmatmul.f32.gmra.mxu3 %v991_v61 }
 0x45d   : > { %v1202_v14 = vsel %vm562_vm2, %v1149_v43, 0.0 }
 0x45e   : > { %v1203_v21 = vadd.f32 %v1202_v14, %v1201_v28 }
 0x462   : > { %v955_v58 = vpop.xlane.xlu0 %954 }
 0x463   : > { %1858 = vrcp.f32 %v955_v58 }
 0x468   : > { %v1069_v12 = vpop.f32.mrf.mxu3 }
 0x469   : > { %v1859_v46 = vpop.eup %1858  ;;  %v1134_v26 = vmul.f32 %v2462_v11, %v1069_v12 }
 0x46a   : > { %v992_v27 = vmul.f32 %v1859_v46, %v2435_v23 }
 0x46b   : > { %v1150_v40 = vadd.f32 %v1134_v26, %v540_v33 }
 0x46c   : > { %1092 = vmatmul.f32.gmra.mxu3 %v992_v27 }
 0x46d   : > { %v1204_v29 = vsel %vm562_vm2, %v1150_v40, 0.0  ;;  %v1166_v41 = vsel %vm562_vm2, %v1150_v40, -inf }
 0x46e   : > { %v1205_v30 = vadd.f32 %v1204_v29, %v1203_v21 }
 0x470   : > { %v1072_v24 = vpop.f32.mrf.mxu3 }
 0x471   : > { %v1135_v0 = vmul.f32 %v2462_v11, %v1072_v24 }
 0x472   : > { %v957_v37 = vpop.xlane.xlu1 %956 }
 0x473   : > { %1860 = vrcp.f32 %v957_v37  ;;  %v1151_v49 = vadd.f32 %v1135_v0, %v541_v36 }
 0x475   : > { %v1206_v6 = vsel %vm562_vm2, %v1151_v49, 0.0  ;;  %v1167_v44 = vsel %vm562_vm2, %v1151_v49, -inf }
 0x476   : > { %v1207_v25 = vadd.f32 %v1206_v6, %v1205_v30 }
 0x478   : > { %v1075_v23 = vpop.f32.mrf.mxu3 }
 0x479   : > { %v1861_v34 = vpop.eup %1860  ;;  %v1136_v32 = vmul.f32 %v2462_v11, %v1075_v23 }
 0x47a   : > { %v959_v33 = vpop.xlane.xlu2 %958  ;;  %v993_v52 = vmul.f32 %v1861_v34, %v2443_v55  ;;  %v963_v28 = vpop.xlane.xlu1 %962 }
 0x47b   : > { %v1152_v17 = vadd.f32 %v1136_v32, %v542_v39  ;;  %1862 = vrcp.f32 %v959_v33  ;;  %v1165_v39 = vsel %vm562_vm2, %v1149_v43, -inf }
 0x47c   : > { %1095 = vmatmul.f32.gmra.mxu3 %v993_v52 }
 0x47d   : > { %v1168_v35 = vsel %vm562_vm2, %v1152_v17, -inf  ;;  %v1208_v36 = vsel %vm562_vm2, %v1152_v17, 0.0 }
 0x47e   : > { %v1169_v9 = vmax.f32 %v1164_v18, %v1168_v35  ;;  %v2490_v19 = vadd.f32 %v1208_v36, %v1207_v25 }
 0x480   : > { %v1078_v22 = vpop.f32.mrf.mxu3 }
 0x481   : > { %v1863_v10 = vpop.eup %1862  ;;  %v1137_v3 = vmul.f32 %v2462_v11, %v1078_v22 }
 0x482   : > { %v994_v55 = vmul.f32 %v1863_v10, %v2451_v13  ;;  %v965_v43 = vpop.xlane.xlu2 %964  ;;  %v1272_v10 = vld [vmem:[%s2902_s6 + $0xe0] sm:$0xff] }
 0x483   : > { %v961_v61 = vpop.xlane.xlu0 %960  ;;  %v1153_v38 = vadd.f32 %v1137_v3, %v543_v42  ;;  %1298 = vmatpush.msrb.mxu0 %v1272_v10 }
 0x484   : > { %1864 = vrcp.f32 %v961_v61  ;;  %1098 = vmatmul.f32.gmra.mxu3 %v994_v55 }
 0x485   : > { %v1170_v31 = vsel %vm562_vm2, %v1153_v38, -inf  ;;  %1866 = vrcp.f32 %v963_v28  ;;  %v1210_v3 = vsel %vm562_vm2, %v1153_v38, 0.0  ;;  %v1269_v38 = vld [vmem:[%s2902_s6 + $0xc8] sm:$0xff] }
 0x486   : > { %v1171_v14 = vmax.f32 %v1165_v39, %v1170_v31  ;;  %1868 = vrcp.f32 %v965_v43  ;;  %v1261_v43 = vld [vmem:[%s2902_s6 + $0x88] sm:$0xff] }
 0x488   : > { %v1081_v21 = vpop.f32.mrf.mxu3 }
 0x489   : > { %v1138_v12 = vmul.f32 %v2462_v11, %v1081_v21 }
 0x48a   : > { %v1865_v58 = vpop.eup %1864 }
 0x48b   : > { %v995_v46 = vmul.f32 %v1865_v58, %v2458_v15  ;;  %v1154_v13 = vadd.f32 %v1138_v12, %v544_v45  ;;  %v1867_v27 = vpop.eup %1866 }
 0x48c   : > { %v996_v24 = vmul.f32 %v1867_v27, %v2449_v20  ;;  %v1869_v0 = vpop.eup %1868 }
 0x48d   : > { %1101 = vmatmul.f32.gmra.mxu3 %v995_v46  ;;  %v1172_v42 = vsel %vm562_vm2, %v1154_v13, -inf  ;;  %v997_v37 = vmul.f32 %v1869_v0, %v2456_v16  ;;  %v1212_v55 = vsel %vm562_vm2, %v1154_v13, 0.0  ;;  %v1264_v46 = vld [vmem:[%s2902_s6 + $0xa0] sm:$0xff]  ;;  %v1253_v0 = vld [vmem:[%s2902_s6 + $0x48] sm:$0xff] }
 0x48e   : > { %v1173_v26 = vmax.f32 %v1166_v41, %v1172_v42 }
 0x490   : > { %v1084_v29 = vpop.f32.mrf.mxu3 }
 0x491   : > { %v1139_v30 = vmul.f32 %v2462_v11, %v1084_v29 }
 0x493   : > { %v1155_v15 = vadd.f32 %v1139_v30, %v545_v48 }
 0x495   : > { %1104 = vmatmul.f32.gmra.mxu3 %v996_v24  ;;  %v1174_v45 = vsel %vm562_vm2, %v1155_v15, -inf  ;;  %v1214_v39 = vsel %vm562_vm2, %v1155_v15, 0.0  ;;  %v1257_v24 = vld [vmem:[%s2902_s6 + $0x68] sm:$0xff]  ;;  %v1256_v15 = vld [vmem:[%s2902_s6 + $0x60] sm:$0xff] }
 0x496   : > { %v1175_v40 = vmax.f32 %v1167_v44, %v1174_v45 }
 0x49d   : > { %1107 = vmatmul.f32.gmra.mxu3 %v997_v37  ;;  %v1252_v37 = vld [vmem:[%s2902_s6 + $0x40] sm:$0xff] }
 0x4d7   : > { %v1087_v6 = vpop.f32.mrf.mxu3 }
 0x4d8   : > { %v1140_v25 = vmul.f32 %v2462_v11, %v1087_v6 }
 0x4da   : > { %v1156_v34 = vadd.f32 %v1140_v25, %v546_v51 }
 0x4dc   : > { %v1176_v20 = vsel %vm562_vm2, %v1156_v34, -inf }
 0x4dd   : > { %v1177_v47 = vmax.f32 %v1169_v9, %v1176_v20  ;;  %v1248_v20 = vld [vmem:[%s2902_s6 + $0x20] sm:$0xff] }
 0x4df   : > { %v1090_v48 = vpop.f32.mrf.mxu3 }
 0x4e0   : > { %v1141_v23 = vmul.f32 %v2462_v11, %v1090_v48 }
 0x4e2   : > { %v1157_v49 = vadd.f32 %v1141_v23, %v547_v54 }
 0x4e4   : > { %v1178_v32 = vsel %vm562_vm2, %v1157_v49, -inf }
 0x4e5   : > { %v1179_v33 = vmax.f32 %v1171_v14, %v1178_v32  ;;  %v1216_v14 = vsel %vm562_vm2, %v1156_v34, 0.0  ;;  %v1244_v32 = vld [vmem:[%s2902_s6] sm:$0xff] }
 0x4ef   : > { %v1093_v16 = vpop.f32.mrf.mxu3 }
 0x4f0   : > { %v1142_v52 = vmul.f32 %v2462_v11, %v1093_v16 }
 0x4f2   : > { %v1158_v17 = vadd.f32 %v1142_v52, %v548_v57  ;;  %v1273_v57 = vld [vmem:[%s2902_s6 + $0xe8] sm:$0xff]  ;;  %v1274_v52 = vld [vmem:[%s2902_s6 + $0xf0] sm:$0xff] }
 0x4f3   : > { %1318 = vmatpush.msrb.mxu1 %v1273_v57 }
 0x4f4   : > { %v1180_v50 = vsel %vm562_vm2, %v1158_v17, -inf  ;;  %v1220_v27 = vsel %vm562_vm2, %v1158_v17, 0.0  ;;  %v1275_v17 = vld [vmem:[%s2902_s6 + $0xf8] sm:$0xff] }
 0x4f5   : > { %v2523_v51 = vmax.f32 %v1173_v26, %v1180_v50  ;;  %1319 = vmatpush.msrb.mxu1 %v1269_v38  ;;  %v1260_v26 = vld [vmem:[%s2902_s6 + $0x80] sm:$0xff]  ;;  %v1246_v38 = vld [vmem:[%s2902_s6 + $0x10] sm:$0xff] }
 0x4f7   : > { %1320 = vmatpush.msrb.mxu1 %v1265_v1  ;;  %v1456_v1 = vld [vmem:[%s2904_s8 + $0x1f8] sm:$0xff] }
 0x4f8   : > { %1518 = vmatpush.msrb.mxu2 %v1456_v1  ;;  %v1409_v1 = vld [vmem:[%s2904_s8 + $0x80] sm:$0xff] }
 0x4f9   : > { %1321 = vmatpush.msrb.mxu1 %v1261_v43  ;;  %v1405_v43 = vld [vmem:[%s2904_s8 + $0x60] sm:$0xff] }
 0x4fb   : > { %1322 = vmatpush.msrb.mxu1 %v1257_v24  ;;  %v1403_v24 = vld [vmem:[%s2904_s8 + $0x50] sm:$0xff] }
 0x4fd   : > { %1323 = vmatpush.msrb.mxu1 %v1253_v0  ;;  %v1401_v0 = vld [vmem:[%s2904_s8 + $0x40] sm:$0xff] }
 0x4ff   : > { %v1096_v18 = vpop.f32.mrf.mxu3 }
 0x500   : > { %v1143_v35 = vmul.f32 %v2462_v11, %v1096_v18  ;;  %v1271_v18 = vld [vmem:[%s2902_s6 + $0xd8] sm:$0xff] }
 0x502   : > { %v1159_v53 = vadd.f32 %v1143_v35, %v549_v60 }
 0x504   : > { %v1182_v54 = vsel %vm562_vm2, %v1159_v53, -inf  ;;  %v1222_v44 = vsel %vm562_vm2, %v1159_v53, 0.0 }
 0x505   : > { %v2529_v36 = vmax.f32 %v1175_v40, %v1182_v54 }
 0x507   : > { %v1099_v9 = vpop.f32.mrf.mxu3 }
 0x508   : > { %v1144_v22 = vmul.f32 %v2462_v11, %v1099_v9 }
 0x50a   : > { %v1160_v56 = vadd.f32 %v1144_v22, %v550_v63  ;;  %v1211_v63 = vadd.f32 %v1210_v3, %v2490_v19  ;;  %v1268_v19 = vld [vmem:[%s2902_s6 + $0xc0] sm:$0xff] }
 0x50b   : > { %1299 = vmatpush.msrb.mxu0 %v1268_v19  ;;  %v1247_v19 = vld [vmem:[%s2902_s6 + $0x18] sm:$0xff] }
 0x50c   : > { %v1184_v59 = vsel %vm562_vm2, %v1160_v56, -inf  ;;  %v1213_v28 = vadd.f32 %v1212_v55, %v1211_v63  ;;  %v1224_v6 = vsel %vm562_vm2, %v1160_v56, 0.0  ;;  %v1263_v63 = vld [vmem:[%s2902_s6 + $0x98] sm:$0xff] }
 0x50d   : > { %v1185_v60 = vmax.f32 %v1177_v47, %v1184_v59  ;;  %1300 = vmatpush.msrb.mxu0 %v1264_v46  ;;  %v1455_v46 = vld [vmem:[%s2904_s8 + $0x1f0] sm:$0xff] }
 0x50e   : > { %v1215_v58 = vadd.f32 %v1214_v39, %v1213_v28  ;;  %v1258_v39 = vld [vmem:[%s2902_s6 + $0x70] sm:$0xff]  ;;  %1519 = vmatpush.msrb.mxu2 %v1455_v46  ;;  %v1428_v46 = vld [vmem:[%s2904_s8 + $0x118] sm:$0xff] }
 0x50f   : > { %1301 = vmatpush.msrb.mxu0 %v1260_v26  ;;  %v1254_v28 = vld [vmem:[%s2902_s6 + $0x50] sm:$0xff]  ;;  %v1453_v26 = vld [vmem:[%s2904_s8 + $0x1e0] sm:$0xff] }
 0x510   : > { %v1102_v61 = vpop.f32.mrf.mxu3  ;;  %v1217_v13 = vadd.f32 %v1216_v14, %v1215_v58  ;;  %v1255_v14 = vld [vmem:[%s2902_s6 + $0x58] sm:$0xff]  ;;  %v1250_v58 = vld [vmem:[%s2902_s6 + $0x30] sm:$0xff] }
 0x511   : > { %v1145_v62 = vmul.f32 %v2462_v11, %v1102_v61  ;;  %1302 = vmatpush.msrb.mxu0 %v1256_v15  ;;  %v1451_v15 = vld [vmem:[%s2904_s8 + $0x1d0] sm:$0xff] }
 0x513   : > { %v1161_v31 = vadd.f32 %v1145_v62, %v551_v2  ;;  %v1218_v2 = vsel %vm562_vm2, %v1157_v49, 0.0  ;;  %1303 = vmatpush.msrb.mxu0 %v1252_v37  ;;  %v1245_v49 = vld [vmem:[%s2902_s6 + $0x8] sm:$0xff]  ;;  %v1449_v37 = vld [vmem:[%s2904_s8 + $0x1c0] sm:$0xff] }
 0x514   : > { %v1219_v30 = vadd.f32 %v1218_v2, %v1217_v13  ;;  %v1407_v2 = vld [vmem:[%s2904_s8 + $0x70] sm:$0xff] }
 0x515   : > { %v1186_v21 = vsel %vm562_vm2, %v1161_v31, -inf  ;;  %v1226_v47 = vsel %vm562_vm2, %v1161_v31, 0.0  ;;  %1304 = vmatpush.msrb.mxu0 %v1248_v20  ;;  %v1259_v31 = vld [vmem:[%s2902_s6 + $0x78] sm:$0xff]  ;;  %v1398_v20 = vld [vmem:[%s2904_s8 + $0x28] sm:$0xff] }
 0x516   : > { %v1187_v12 = vmax.f32 %v1179_v33, %v1186_v21  ;;  %v1221_v40 = vadd.f32 %v1220_v27, %v1219_v30  ;;  %v1408_v21 = vld [vmem:[%s2904_s8 + $0x78] sm:$0xff] }
 0x517   : > { %1305 = vmatpush.msrb.mxu0 %v1244_v32  ;;  %1458 = vmatpush.msrb.mxu3 %v1408_v21  ;;  %v1404_v27 = vld [vmem:[%s2904_s8 + $0x58] sm:$0xff] }
 0x518   : > { %v1192_v41 = vmax.f32 %v1185_v60, %v1187_v12  ;;  %v1105_v42 = vpop.f32.mrf.mxu3  ;;  %v1223_v34 = vadd.f32 %v1222_v44, %v1221_v40  ;;  %v1251_v12 = vld [vmem:[%s2902_s6 + $0x38] sm:$0xff]  ;;  %v1402_v44 = vld [vmem:[%s2904_s8 + $0x48] sm:$0xff] }
 0x519   : > { %v1146_v29 = vmul.f32 %v2462_v11, %v1105_v42  ;;  %1338 = vmatpush.msra.mxu0 %v1274_v52  ;;  %1459 = vmatpush.msrb.mxu3 %v1407_v2  ;;  %v1454_v42 = vld [vmem:[%s2904_s8 + $0x1e8] sm:$0xff]  ;;  %v1452_v30 = vld [vmem:[%s2904_s8 + $0x1d8] sm:$0xff]  ;;  %v1429_v2 = vld [vmem:[%s2904_s8 + $0x120] sm:$0xff] }
 0x51a   : > { %v1225_v48 = vadd.f32 %v1224_v6, %v1223_v34  ;;  %1520 = vmatpush.msrb.mxu2 %v1454_v42  ;;  %v1450_v40 = vld [vmem:[%s2904_s8 + $0x1c8] sm:$0xff]  ;;  %v1400_v6 = vld [vmem:[%s2904_s8 + $0x38] sm:$0xff] }
 0x51b   : > { %v1162_v45 = vadd.f32 %v1146_v29, %v552_v5  ;;  %v1249_v5 = vld [vmem:[%s2902_s6 + $0x28] sm:$0xff]  ;;  %v1448_v34 = vld [vmem:[%s2904_s8 + $0x1b8] sm:$0xff] }
 0x51c   : > { %1324 = vmatpush.msrb.mxu1 %v1249_v5  ;;  %v1227_v50 = vadd.f32 %v1226_v47, %v1225_v48  ;;  %1521 = vmatpush.msrb.mxu2 %v1453_v26  ;;  %v1447_v5 = vld [vmem:[%s2904_s8 + $0x1b0] sm:$0xff]  ;;  %v1446_v48 = vld [vmem:[%s2904_s8 + $0x1a8] sm:$0xff]  ;;  %v1396_v32 = vld [vmem:[%s2904_s8 + $0x18] sm:$0xff] }
 0x51d   : > { %v1188_v25 = vsel %vm562_vm2, %v1162_v45, -inf  ;;  %v1228_v33 = vsel %vm562_vm2, %v1162_v45, 0.0  ;;  %v1424_v52 = vld [vmem:[%s2904_s8 + $0xf8] sm:$0xff]  ;;  %v1426_v42 = vld [vmem:[%s2904_s8 + $0x108] sm:$0xff]  ;;  %v1276_v26 = vld [vmem:[%s2903_s7] sm:$0xf] }
 0x51e   : > { %v1189_v4 = vmax.f32 %v2523_v51, %v1188_v25  ;;  %1325 = vmatpush.msrb.mxu1 %v1245_v49  ;;  %v1229_v35 = vadd.f32 %v1228_v33, %v1227_v50  ;;  %1522 = vmatpush.msrb.mxu2 %v1452_v30  ;;  %v1445_v49 = vld [vmem:[%s2904_s8 + $0x1a0] sm:$0xff]  ;;  %v1412_v21 = vld [vmem:[%s2904_s8 + $0x98] sm:$0xff] }
 0x520   : > { %v1108_v23 = vpop.f32.mrf.mxu3  ;;  %1358 = vmatpush.msra.mxu1 %v1275_v17  ;;  %1523 = vmatpush.msrb.mxu2 %v1451_v15  ;;  %v1444_v17 = vld [vmem:[%s2904_s8 + $0x198] sm:$0xff] }
 0x521   : > { %v1147_v16 = vmul.f32 %v2462_v11, %v1108_v23  ;;  %v1270_v11 = vld [vmem:[%s2902_s6 + $0xd0] sm:$0xff]  ;;  %v1397_v23 = vld [vmem:[%s2904_s8 + $0x20] sm:$0xff] }
 0x522   : > { %1339 = vmatpush.msra.mxu0 %v1270_v11  ;;  %1359 = vmatpush.msra.mxu1 %v1271_v18  ;;  %v1395_v11 = vld [vmem:[%s2904_s8 + $0x10] sm:$0xff] }
 0x523   : > { %v1163_v51 = vadd.f32 %v1147_v16, %v553_v8  ;;  %v1267_v8 = vld [vmem:[%s2902_s6 + $0xb8] sm:$0xff]  ;;  %1524 = vmatpush.msrb.mxu2 %v1450_v40  ;;  %v1423_v18 = vld [vmem:[%s2904_s8 + $0xf0] sm:$0xff] }
 0x524   : > { %1340 = vmatpush.msra.mxu0 %v1266_v7  ;;  %1360 = vmatpush.msra.mxu1 %v1267_v8  ;;  %v1422_v7 = vld [vmem:[%s2904_s8 + $0xe8] sm:$0xff] }
 0x525   : > { %v1190_v53 = vsel %vm562_vm2, %v1163_v51, -inf  ;;  %v1230_v54 = vsel %vm562_vm2, %v1163_v51, 0.0  ;;  %1525 = vmatpush.msrb.mxu2 %v1449_v37  ;;  %v1440_v51 = vld [vmem:[%s2904_s8 + $0x178] sm:$0xff]  ;;  %v1442_v8 = vld [vmem:[%s2904_s8 + $0x188] sm:$0xff]  ;;  %v1281_v37 = vperm.slane %v1276_v26, 3 }
 0x526   : > { %v1191_v9 = vmax.f32 %v2529_v36, %v1190_v53  ;;  %v1231_v22 = vadd.f32 %v1230_v54, %v1229_v35  ;;  %v1262_v36 = vld [vmem:[%s2902_s6 + $0x90] sm:$0xff]  ;;  %1361 = vmatpush.msra.mxu1 %v1263_v63  ;;  %v1394_v54 = vld [vmem:[%s2904_s8 + $0x8] sm:$0xff]  ;;  %v1433_v63 = vld [vmem:[%s2904_s8 + $0x140] sm:$0xff] }
 0x527   : > { %1341 = vmatpush.msra.mxu0 %v1262_v36  ;;  %1526 = vmatpush.msrb.mxu2 %v1448_v34  ;;  %v1443_v35 = vld [vmem:[%s2904_s8 + $0x190] sm:$0xff]  ;;  %v1416_v36 = vld [vmem:[%s2904_s8 + $0xb8] sm:$0xff] }
 0x528   : > { %v1193_v56 = vmax.f32 %v1189_v4, %v1191_v9  ;;  %v1232_v57 = vrot.slane %v1231_v22, 4  ;;  %1362 = vmatpush.msra.mxu1 %v1259_v31  ;;  %v1399_v4 = vld [vmem:[%s2904_s8 + $0x30] sm:$0xff]  ;;  %v1438_v9 = vld [vmem:[%s2904_s8 + $0x168] sm:$0xff]  ;;  %v1432_v31 = vld [vmem:[%s2904_s8 + $0x138] sm:$0xff] }
 0x529   : > { %1342 = vmatpush.msra.mxu0 %v1258_v39  ;;  %1527 = vmatpush.msrb.mxu2 %v1447_v5  ;;  %v1439_v53 = vld [vmem:[%s2904_s8 + $0x170] sm:$0xff]  ;;  %v1388_v5 = vlaneseq }
 0x52a   : > { %v1194_v10 = vmax.f32 %v1192_v41, %v1193_v56  ;;  %v1233_v59 = vadd.f32 %v1232_v57, %v1231_v22  ;;  %1363 = vmatpush.msra.mxu1 %v1255_v14  ;;  %v1406_v41 = vld [vmem:[%s2904_s8 + $0x68] sm:$0xff]  ;;  %v1393_v22 = vld [vmem:[%s2904_s8] sm:$0xff]  ;;  %v1420_v57 = vld [vmem:[%s2904_s8 + $0xd8] sm:$0xff] }
 0x52b   : > { %1343 = vmatpush.msra.mxu0 %v1254_v28  ;;  %1460 = vmatpush.msrb.mxu3 %v1406_v41  ;;  %v1421_v56 = vld [vmem:[%s2904_s8 + $0xe0] sm:$0xff]  ;;  %v1415_v39 = vld [vmem:[%s2904_s8 + $0xb0] sm:$0xff]  ;;  %v1414_v28 = vld [vmem:[%s2904_s8 + $0xa8] sm:$0xff]  ;;  %vm1390_vm12 = vcmp.lt.s32.totalorder %v1388_v5, 512 }
 0x52c   : > { %v1234_v60 = vrot.slane %v1233_v59, 2  ;;  %1364 = vmatpush.msra.mxu1 %v1251_v12  ;;  %v1195_v13 = vrot.slane %v1194_v10, 4  ;;  %1528 = vmatpush.msrb.mxu2 %v1446_v48  ;;  %v1413_v14 = vld [vmem:[%s2904_s8 + $0xa0] sm:$0xff]  ;;  %v1431_v12 = vld [vmem:[%s2904_s8 + $0x130] sm:$0xff] }
 0x52d   : > { %1344 = vmatpush.msra.mxu0 %v1250_v58  ;;  %1461 = vmatpush.msrb.mxu3 %v1405_v43  ;;  %v1411_v58 = vld [vmem:[%s2904_s8 + $0x90] sm:$0xff]  ;;  %v1425_v43 = vld [vmem:[%s2904_s8 + $0x100] sm:$0xff] }
 0x52e   : > { %v1235_v3 = vadd.f32 %v1234_v60, %v1233_v59  ;;  %1365 = vmatpush.msra.mxu1 %v1247_v19  ;;  %v1196_v29 = vmax.f32 %v1194_v10, %v1195_v13  ;;  %1529 = vmatpush.msrb.mxu2 %v1445_v49  ;;  %v1437_v10 = vld [vmem:[%s2904_s8 + $0x160] sm:$0xff]  ;;  %v1419_v59 = vld [vmem:[%s2904_s8 + $0xd0] sm:$0xff]  ;;  %v1436_v60 = vld [vmem:[%s2904_s8 + $0x158] sm:$0xff] }
 0x52f   : > { %1345 = vmatpush.msra.mxu0 %v1246_v38  ;;  %1462 = vmatpush.msrb.mxu3 %v1404_v27  ;;  %v1410_v38 = vld [vmem:[%s2904_s8 + $0x88] sm:$0xff]  ;;  %v1441_v13 = vld [vmem:[%s2904_s8 + $0x180] sm:$0xff]  ;;  %v1427_v41 = vld [vmem:[%s2904_s8 + $0x110] sm:$0xff]  ;;  %v1278_v27 = vperm.slane %v1276_v26, 0 }
 0x530   : > { %v1236_v61 = vrot.slane %v1235_v3, 1  ;;  %v1197_v45 = vrot.slane %v1196_v29, 2  ;;  %1530 = vmatpush.msrb.mxu2 %v1444_v17  ;;  %v1430_v19 = vld [vmem:[%s2904_s8 + $0x128] sm:$0xff] }
 0x531   : > { %1463 = vmatpush.msrb.mxu3 %v1403_v24 }
 0x532   : > { %v1237_v55 = vadd.f32 %v1236_v61, %v1235_v3  ;;  %v1198_v25 = vmax.f32 %v1196_v29, %v1197_v45  ;;  %1531 = vmatpush.msrb.mxu2 %v1443_v35  ;;  %v1418_v3 = vld [vmem:[%s2904_s8 + $0xc8] sm:$0xff]  ;;  %v1435_v61 = vld [vmem:[%s2904_s8 + $0x150] sm:$0xff]  ;;  %v1279_v29 = vperm.slane %v1276_v26, 1 }
 0x533   : > { %1464 = vmatpush.msrb.mxu3 %v1402_v44 }
 0x534   : > { %v1238_v62 = vmul.f32 0.0078125, %v1237_v55  ;;  %v1199_v47 = vrot.slane %v1198_v25, 1  ;;  %1532 = vmatpush.msrb.mxu2 %v1442_v8  ;;  %v1417_v55 = vld [vmem:[%s2904_s8 + $0xc0] sm:$0xff] }
 0x535   : > { %1465 = vmatpush.msrb.mxu3 %v1401_v0  ;;  %v1280_v0 = vperm.slane %v1276_v26, 2 }
 0x536   : > { %1240 = vrot.lane.b32.xlu0 %v1238_v62, %s1936_s13  ;;  %v1200_v33 = vmax.f32 %v1198_v25, %v1199_v47  ;;  %v1434_v62 = vld [vmem:[%s2904_s8 + $0x148] sm:$0xff]  ;;  %1533 = vmatpush.msrb.mxu2 %v1441_v13  ;;  %s386_s13 = scalar_lea.vmem [#allocation3], %s385_s23 }
 0x537   : > { %1466 = vmatpush.msrb.mxu3 %v1400_v6  ;;  %s1557_s12 = sshll.u32 %s386_s13, 4  ;;  %s1558_s12 = int_to_ptr.vmem [resolvable:$true] %s1557_s12 }
 0x539   : > { %1467 = vmatpush.msrb.mxu3 %v1399_v4 }
 0x53b   : > { %1468 = vmatpush.msrb.mxu3 %v1398_v20 }
 0x53d   : > { %1469 = vmatpush.msrb.mxu3 %v1397_v23 }
 0x53f   : > { %1470 = vmatpush.msrb.mxu3 %v1396_v32 }
 0x541   : > { %1471 = vmatpush.msrb.mxu3 %v1395_v11 }
 0x543   : > { %1472 = vmatpush.msrb.mxu3 %v1394_v54 }
 0x545   : > { %1473 = vmatpush.msrb.mxu3 %v1393_v22 }
 0x5a8   : > { %v1241_v16 = vpop.permute.xlu0 %1240 }
 0x5a9   : > { %v1243_v50 = vsel %vm562_vm2, %v1200_v33, %v1241_v16 }
 0x5aa   : > { %1711 = vmatmul.msk.f32.vlgmr.msrb.gmra.mxu0 %vm1286_vm8, %v1243_v50  ;;  %1712 = vmatmul.msk.f32.vlgmr.msrb.gmra.mxu1 %vm1286_vm8, %v1243_v50 }
 0x5ab   : > { %1478 = vmatpush.msrb.mxu0 %v1424_v52  ;;  %1498 = vmatpush.msrb.mxu1 %v1440_v51  ;;  %v1457_v52 = vld [vmem:[%s2905_s9] sm:$0x1] }
 0x5ad   : > { %1479 = vmatpush.msrb.mxu0 %v1423_v18  ;;  %1499 = vmatpush.msrb.mxu1 %v1439_v53 }
 0x5af   : > { %1480 = vmatpush.msrb.mxu0 %v1422_v7  ;;  %1500 = vmatpush.msrb.mxu1 %v1438_v9 }
 0x5b1   : > { %1481 = vmatpush.msrb.mxu0 %v1421_v56  ;;  %1501 = vmatpush.msrb.mxu1 %v1437_v10 }
 0x5b2   : > { %1713 = vmatmul.msk.f32.vlgmr.msra.gmra.mxu0 %vm1286_vm8, %v1243_v50  ;;  %1714 = vmatmul.msk.f32.vlgmr.msra.gmra.mxu1 %vm1286_vm8, %v1243_v50 }
 0x5b3   : > { %1482 = vmatpush.msrb.mxu0 %v1420_v57  ;;  %1502 = vmatpush.msrb.mxu1 %v1436_v60 }
 0x5b5   : > { %1483 = vmatpush.msrb.mxu0 %v1419_v59  ;;  %1503 = vmatpush.msrb.mxu1 %v1435_v61 }
 0x5b7   : > { %1484 = vmatpush.msrb.mxu0 %v1418_v3  ;;  %1504 = vmatpush.msrb.mxu1 %v1434_v62 }
 0x5b9   : > { %1485 = vmatpush.msrb.mxu0 %v1417_v55  ;;  %1505 = vmatpush.msrb.mxu1 %v1433_v63 }
 0x5bb   : > { %1486 = vmatpush.msrb.mxu0 %v1416_v36  ;;  %1506 = vmatpush.msrb.mxu1 %v1432_v31 }
 0x5bd   : > { %1487 = vmatpush.msrb.mxu0 %v1415_v39  ;;  %1507 = vmatpush.msrb.mxu1 %v1431_v12 }
 0x5bf   : > { %1488 = vmatpush.msrb.mxu0 %v1414_v28  ;;  %1508 = vmatpush.msrb.mxu1 %v1430_v19 }
 0x5c1   : > { %1489 = vmatpush.msrb.mxu0 %v1413_v14  ;;  %1509 = vmatpush.msrb.mxu1 %v1429_v2 }
 0x5c3   : > { %1490 = vmatpush.msrb.mxu0 %v1412_v21  ;;  %1510 = vmatpush.msrb.mxu1 %v1428_v46 }
 0x5c5   : > { %1491 = vmatpush.msrb.mxu0 %v1411_v58  ;;  %1511 = vmatpush.msrb.mxu1 %v1427_v41 }
 0x5c7   : > { %1492 = vmatpush.msrb.mxu0 %v1410_v38  ;;  %1512 = vmatpush.msrb.mxu1 %v1426_v42 }
 0x5c9   : > { %1493 = vmatpush.msrb.mxu0 %v1409_v1  ;;  %1513 = vmatpush.msrb.mxu1 %v1425_v43 }
 0x627   : > { %v1307_v30 = vpop.f32.mrf.mxu0  ;;  %v1327_v24 = vpop.f32.mrf.mxu1 }
 0x628   : > { %v1308_v15 = vadd.f32 %v1307_v30, %v1278_v27  ;;  %v1328_v44 = vadd.f32 %v1327_v24, %v1279_v29 }
 0x62a   : > { %v1370_v45 = vmax.f32 %v1308_v15, 0.0  ;;  %v1371_v40 = vmax.f32 %v1328_v44, 0.0 }
 0x62c   : > { %1474 = vmatmul.f32.vlgmr.msrb.gmra.mxu3 %v1370_v45  ;;  %1494 = vmatmul.f32.vlgmr.msrb.gmra.mxu0 %v1371_v40  ;;  %v1378_v20 = vrot.slane %v1371_v40, 7 }
 0x62e   : > { %v1382_v32 = vsel %vm1381_vm9, %v1370_v45, %v1378_v20 }
 0x62f   : > { %v1347_v6 = vpop.f32.mrf.mxu0  ;;  %v1367_v25 = vpop.f32.mrf.mxu1 }
 0x630   : > { %v1348_v34 = vadd.f32 %v1347_v6, %v1280_v0  ;;  %v1368_v4 = vadd.f32 %v1367_v25, %v1281_v37 }
 0x632   : > { %v1372_v47 = vmax.f32 %v1348_v34, 0.0  ;;  %v1373_v48 = vmax.f32 %v1368_v4, 0.0 }
 0x634   : > { %v1379_v23 = vrot.slane %v1372_v47, 6  ;;  %v1380_v49 = vrot.slane %v1373_v48, 5  ;;  %1514 = vmatmul.f32.vlgmr.msrb.gmra.mxu1 %v1372_v47  ;;  %1534 = vmatmul.f32.vlgmr.msrb.gmra.mxu2 %v1373_v48 }
 0x636   : > { %v1384_v33 = vsel %vm1383_vm10, %v1379_v23, %v1380_v49 }
 0x637   : > { %v1386_v16 = vsel %vm1385_vm11, %v1382_v32, %v1384_v33 }
 0x638   : > { %1392 = vst.msk [vmem:[%s395_s16] sm:$0xf] %vm1390_vm12, %v1386_v16  ;;  %s1884_s16 = sshra.s32 %s1560_s14, 4  ;;  %s1885_s16 = int_to_ptr.hbm [resolvable:$true] %s1884_s16 }
 0x639   : > { %s1886_s17 = scalar_lea.hbm %s1885_s16, 1  ;;  %p1891_p0 = scmp.lt.s32.totalorder %s1885_s16, %s2907_s11 }
 0x63a   : > { %p1887_p11 = scmp.ne.s32.totalorder %s1885_s16, %s1886_s17  ;;  %p1892_p1 = scmp.lt.s32.totalorder %s1890_s25, %s1886_s17 }
 0x63c   : > { %p1888_p12 = pnand %p1887_p11, %p2038_p5  ;;  %p1893_p2 = por %p1892_p1, %p1891_p0 }
 0x63e   : > { %p1889_p13 = pneg %p1888_p12 }
 0x640   : > { %p1894_p3 = pnand %p1893_p2, %p1889_p13 }
 0x6a9   : > { %v1495_v51 = vpop.f32.mrf.mxu0 }
 0x6af   : > { %v1475_v17 = vpop.f32.mrf.mxu3 }
 0x6b0   : > { %v1476_v50 = vadd.f32 %v1475_v17, %v1457_v52 }
 0x6b1   : > { %v1515_v18 = vpop.f32.mrf.mxu1 }
 0x6b2   : > { %v1496_v11 = vadd.f32 %v1495_v51, %v1476_v50 }
 0x6b4   : > { %v1516_v35 = vadd.f32 %v1515_v18, %v1496_v11 }
 0x6b7   : > { %v1535_v53 = vpop.f32.mrf.mxu2 }
 0x6b8   : > { %v1536_v54 = vadd.f32 %v1535_v53, %v1516_v35 }
 0x6ba   : > { %1538 = vst [vmem:[%s386_s13] sm:$0x1] %v1536_v54 }
 0x6bb   : > { %1897 = shalt.err (!%p1894_p3)
}
 0x6bc   : > { %1718 = dma.vmem_to_hbm [thread:$0]  (%p2038_p5), %s1558_s12, 16, %s1560_s14, %s1544_s15  }
 0x6bd PF: > { %p1724_p4 = scmp.ge.s32.totalorder %s1932_s22, 2  ;;  %s1578_s23 = sand.u32 1, %s1920_s19  }
 0x6be   : > { %s1579_s13 = scalar_lea.sflag [#allocation4], %s1578_s23 }
 0x6bf   : > { %p1721_p7 = pnand %p1724_p4, %p2042_p6 }
 0x6c1   : > { %p1722_p8 = pneg %p1721_p7 }
 0x6c3   : > { %1915 = dma.done.wait (%p1722_p8), %s1579_s13, 16  }
 0x6c4   : > { %1917 = vsyncadd (%p1722_p8), %s1579_s13, 4294967280  ;;  %p23_p9 = scmp.ge.s32.totalorder %s2025_s24, 4   ;;  %s2910_s19 = smov %s1924_s20 }
 0x6c5   : > { %s2911_s20 = smov %s1928_s21  ;;  %s2912_s21 = smov %s2036_s27 }
 0x6c6   : > { %s2913_s22 = smov %s2025_s24  ;;  %25 = sbr.rel (!%p23_p9) target bundleno = 5 (0x5), region = 107 }
 0x6cb   :  { %1584 = vsyncpa [#allocation4], 1 }
 0x6cc   :  { %1586 = vsyncpa [#allocation4 + $0x1], 1 }

</bundles_post_ra>
